<compile_context>
chip_gen: v5e
topology: v5e:2x2
jax: 0.10.0
libtpu: 0.0.40
codegen_flags: <defaults>
</compile_context>

<pallas_src>
import jax
import jax.numpy as jnp
from jax import lax
from jax.experimental import pallas as pl
from jax.experimental.pallas import tpu as pltpu

# ---------------------------- problem sizes (small, synthetic) ----------------------------
B = 2            # batch
C_IN = 3         # image channels
H = W = 16       # image spatial (1x1-conv backbone, stride 1 -> feature map 16x16)
HIDDEN = 32      # backbone hidden channels
NUM_CLASSES = 8
NUM_ANNOTS = 8   # max annotations per image (padded with -1)
A = H * W        # number of anchors (1 anchor / location)

K_PAD = 8                     # input channels padded 3 -> 8 (clean sublane layout)
HEAD_DIM = NUM_CLASSES + 4    # 12 = cls logits (8) + box deltas (4)
HEAD_PAD = 16                 # head rows padded 12 -> 16 (two clean sublane tiles)

ALPHA = 0.25
GAMMA = 2.0                   # implemented as an explicit square below


# ================= fused Pallas kernel: backbone + heads + focal loss (per image) ==========
def fused_model_loss_kernel(x_ref, w1t_ref, b1t_ref, wht_ref, bht_ref,
                            anchor_ref, annot_ref, out_ref):
    # x_ref     : [1, K_PAD, A]   per-image input, channels on sublanes, anchors on lanes
    # w1t_ref   : [HIDDEN, K_PAD] backbone 1x1-conv weight (transposed)
    # b1t_ref   : [HIDDEN, 1]
    # wht_ref   : [HEAD_PAD, HIDDEN] rows 0:8 cls, 8:12 reg (dy,dx,dh,dw), 12:16 zero
    # bht_ref   : [HEAD_PAD, 1]
    # anchor_ref: [8, A]           rows: y1, x1, y2, x2, w, h, cx, cy   (shared across batch)
    # annot_ref : [B, N, 5] in SMEM, (x1, y1, x2, y2, class), padded rows == -1
    # out_ref   : [1, 1, 128]      lane 0 = focal cls loss, lane 1 = smooth-L1 reg loss
    b = pl.program_id(0)

    # ------------------------------- forward (two MXU matmuls) ----------------------------
    x = x_ref[0]                                                      # [K_PAD, A]
    feat = jnp.dot(w1t_ref[...], x, preferred_element_type=jnp.float32) + b1t_ref[...]
    feat = jnp.maximum(feat, 0.0)                                     # ReLU backbone, [HIDDEN, A]
    y = jnp.dot(wht_ref[...], feat, preferred_element_type=jnp.float32) + bht_ref[...]  # [16, A]

    cls_logits = y[0:NUM_CLASSES, :]                                  # [C, A]
    reg_dy = y[NUM_CLASSES + 0:NUM_CLASSES + 1, :]                    # [1, A]
    reg_dx = y[NUM_CLASSES + 1:NUM_CLASSES + 2, :]
    reg_dh = y[NUM_CLASSES + 2:NUM_CLASSES + 3, :]
    reg_dw = y[NUM_CLASSES + 3:NUM_CLASSES + 4, :]

    # -------------------------------- anchor constants ------------------------------------
    a_y1 = anchor_ref[0:1, :]
    a_x1 = anchor_ref[1:2, :]
    a_y2 = anchor_ref[2:3, :]
    a_x2 = anchor_ref[3:4, :]
    aw = anchor_ref[4:5, :]
    ah = anchor_ref[5:6, :]
    acx = anchor_ref[6:7, :]
    acy = anchor_ref[7:8, :]
    area_a = aw * ah                                                  # [1, A]

    c_dim, a_dim = cls_logits.shape

    # ----------------- IoU matching (annotations as SMEM scalars, anchors on lanes) --------
    # Padded (-1) annotations never win: their IoU is forced to -1 while valid IoUs are >= 0.
    best_iou = jnp.full((1, a_dim), -1.0, jnp.float32)
    best_x1 = jnp.zeros((1, a_dim), jnp.float32)
    best_y1 = jnp.zeros((1, a_dim), jnp.float32)
    best_x2 = jnp.zeros((1, a_dim), jnp.float32)
    best_y2 = jnp.zeros((1, a_dim), jnp.float32)
    best_cls = jnp.full((1, a_dim), -1.0, jnp.float32)

    for n in range(NUM_ANNOTS):  # N is small & static -> fully unrolled
        g_x1 = annot_ref[b, n, 0]                                     # scalar reads from SMEM
        g_y1 = annot_ref[b, n, 1]
        g_x2 = annot_ref[b, n, 2]
        g_y2 = annot_ref[b, n, 3]
        g_c = annot_ref[b, n, 4]
        valid = g_c != -1.0                                           # scalar bool

        area_g = (g_x2 - g_x1) * (g_y2 - g_y1)                        # scalar
        iw = jnp.maximum(jnp.minimum(a_x2, g_x2) - jnp.maximum(a_x1, g_x1), 0.0)
        ih = jnp.maximum(jnp.minimum(a_y2, g_y2) - jnp.maximum(a_y1, g_y1), 0.0)
        inter = iw * ih
        ua = jnp.maximum(area_a + area_g - inter, 1e-8)
        iou = jnp.where(valid, inter / ua, -1.0)                      # [1, A]

        better = iou > best_iou                                       # strict ">" keeps first max
        best_iou = jnp.where(better, iou, best_iou)
        best_x1 = jnp.where(better, g_x1, best_x1)                    # scalar splat selects
        best_y1 = jnp.where(better, g_y1, best_y1)
        best_x2 = jnp.where(better, g_x2, best_x2)
        best_y2 = jnp.where(better, g_y2, best_y2)
        best_cls = jnp.where(better, g_c, best_cls)

    pos = best_iou >= 0.5                                             # [1, A]
    neg = best_iou < 0.4                                              # [1, A]
    num_pos = jnp.sum(pos.astype(jnp.float32))                        # scalar

    # ---------------- classification (focal) loss, logits (BCE-with-logits) ----------------
    # log_sigmoid(x) = min(x, 0) - log(1 + exp(-|x|)); log(1 - sigmoid(x)) = log_sigmoid(x) - x.
    softplus_t = jnp.log(1.0 + jnp.exp(-jnp.abs(cls_logits)))
    log_p = jnp.minimum(cls_logits, 0.0) - softplus_t                 # [C, A]
    log_1mp = log_p - cls_logits
    p = jnp.exp(log_p)                                                # == sigmoid(logits)

    class_iota = lax.broadcasted_iota(jnp.int32, (c_dim, a_dim), 0).astype(jnp.float32)
    onehot = (class_iota == best_cls).astype(jnp.float32)             # [C, A]
    # targets: 1 at assigned class of positives, 0 elsewhere for positives and for IoU<0.4,
    # -1 (ignored) for 0.4 <= IoU < 0.5
    targets = jnp.where(pos, onehot, jnp.where(neg, 0.0, -1.0))

    is_pos_t = targets == 1.0
    alpha_factor = jnp.where(is_pos_t, ALPHA, 1.0 - ALPHA)
    focal_weight = jnp.where(is_pos_t, 1.0 - p, p)
    focal_weight = alpha_factor * focal_weight * focal_weight         # gamma == 2.0
    bce = -(targets * log_p + (1.0 - targets) * log_1mp)
    cls_loss = jnp.where(targets != -1.0, focal_weight * bce, 0.0)
    cls_total = jnp.sum(cls_loss) / jnp.maximum(num_pos, 1.0)

    # -------------------------------- regression (smooth-L1) -------------------------------
    gw_raw = best_x2 - best_x1
    gh_raw = best_y2 - best_y1
    gcx = best_x1 + 0.5 * gw_raw
    gcy = best_y1 + 0.5 * gh_raw
    gw = jnp.maximum(gw_raw, 1.0)
    gh = jnp.maximum(gh_raw, 1.0)

    tdx = (gcx - acx) / aw
    tdy = (gcy - acy) / ah
    tdw = jnp.log(gw / aw)
    tdh = jnp.log(gh / ah)

    def smooth_l1(t, r):
        d = jnp.abs(t - r)
        return jnp.where(d <= 1.0 / 9.0, 0.5 * 9.0 * d * d, d - 0.5 / 9.0)

    reg_elems = (smooth_l1(tdy, reg_dy) + smooth_l1(tdx, reg_dx)
                 + smooth_l1(tdh, reg_dh) + smooth_l1(tdw, reg_dw))   # [1, A]
    reg_sum = jnp.sum(jnp.where(pos, reg_elems, 0.0))
    reg_total = jnp.where(num_pos > 0.0, reg_sum / jnp.maximum(num_pos * 4.0, 1.0), 0.0)

    # Lane-packed per-image output: lane 0 = cls loss, lane 1 = reg loss (full-lane store).
    lane = lax.broadcasted_iota(jnp.int32, (1, 1, 128), 2)
    out = jnp.where(lane == 0, cls_total, jnp.where(lane == 1, reg_total, 0.0))
    out_ref[...] = out


# ================================ wrapper / synthetic model ===============================
def make_anchor_info(h, w, stride=1.0, size=3.0):
    # Precompute anchor corners + widths/heights/centers once (hoisted out of the loss kernel).
    yy = (jnp.arange(h, dtype=jnp.float32) + 0.5) * stride
    xx = (jnp.arange(w, dtype=jnp.float32) + 0.5) * stride
    cy, cx = jnp.meshgrid(yy, xx, indexing="ij")
    cy = cy.reshape(-1)
    cx = cx.reshape(-1)
    half = size / 2.0
    y1, x1, y2, x2 = cy - half, cx - half, cy + half, cx + half
    aw = x2 - x1
    ah = y2 - y1
    acx = x1 + 0.5 * aw
    acy = y1 + 0.5 * ah
    # rows: y1, x1, y2, x2, w, h, cx, cy  -> [8, A] (anchors on the lane axis)
    return jnp.stack([y1, x1, y2, x2, aw, ah, acx, acy], axis=0)


def init_params(key):
    k1, k2, k3, _ = jax.random.split(key, 4)
    return {
        "w1": jax.random.normal(k1, (C_IN, HIDDEN), jnp.float32) * 0.1,
        "b1": jnp.zeros((1, HIDDEN), jnp.float32),
        "w_reg": jax.random.normal(k2, (HIDDEN, 4), jnp.float32) * 0.05,
        "b_reg": jnp.zeros((1, 4), jnp.float32),
        "w_cls": jax.random.normal(k3, (HIDDEN, NUM_CLASSES), jnp.float32) * 0.05,
        "b_cls": jnp.full((1, NUM_CLASSES), -2.0, jnp.float32),
    }


def model_with_loss(params, imgs, annotations):
    # Mirrors ModelWithLoss.forward: run model, discard features, apply FocalLoss.
    bsz, c_in, h, w = imgs.shape
    a_dim = h * w
    n_annots = annotations.shape[1]

    # imgs NCHW -> per-image [K_PAD, A]: channels already on the leading (sublane) axis, no
    # transpose needed; pad channels 3 -> 8 with zeros (matching zero rows in w1^T).
    x = jnp.pad(imgs.reshape(bsz, c_in, a_dim), ((0, 0), (0, K_PAD - c_in), (0, 0)))

    # Transposed weights: channels on sublanes end-to-end.
    w1t = jnp.pad(params["w1"], ((0, K_PAD - c_in), (0, 0))).T        # [HIDDEN, K_PAD]
    b1t = params["b1"].reshape(HIDDEN, 1)                             # [HIDDEN, 1]
    w_heads = jnp.concatenate([params["w_cls"], params["w_reg"]], axis=1)   # [HIDDEN, 12]
    wht = jnp.pad(w_heads, ((0, 0), (0, HEAD_PAD - HEAD_DIM))).T      # [HEAD_PAD, HIDDEN]
    b_heads = jnp.concatenate([params["b_cls"], params["b_reg"]], axis=1)   # [1, 12]
    bht = jnp.pad(b_heads, ((0, 0), (0, HEAD_PAD - HEAD_DIM))).reshape(HEAD_PAD, 1)

    anchor_info = make_anchor_info(h, w)                              # [8, A]

    per_image = pl.pallas_call(
        fused_model_loss_kernel,
        out_shape=jax.ShapeDtypeStruct((bsz, 1, 128), jnp.float32),
        grid=(bsz,),
        in_specs=[
            pl.BlockSpec((1, K_PAD, a_dim), lambda b: (b, 0, 0)),     # per-image input
            pl.BlockSpec((HIDDEN, K_PAD), lambda b: (0, 0)),          # backbone weight^T
            pl.BlockSpec((HIDDEN, 1), lambda b: (0, 0)),              # backbone bias
            pl.BlockSpec((HEAD_PAD, HIDDEN), lambda b: (0, 0)),       # combined heads^T
            pl.BlockSpec((HEAD_PAD, 1), lambda b: (0, 0)),            # combined head bias
            pl.BlockSpec((8, a_dim), lambda b: (0, 0)),               # anchor info (shared)
            pl.BlockSpec(memory_space=pltpu.MemorySpace.SMEM),        # annotations (scalars)
        ],
        out_specs=pl.BlockSpec((1, 1, 128), lambda b: (b, 0, 0)),
        compiler_params=pltpu.CompilerParams(dimension_semantics=("parallel",)),
    )(x, w1t, b1t, wht, bht, anchor_info, annotations)

    # matches torch: stack(per-image losses).mean(dim=0, keepdim=True) -> shape [1]
    cls_loss = jnp.mean(per_image[:, 0, 0]).reshape(1)
    reg_loss = jnp.mean(per_image[:, 0, 1]).reshape(1)
    return cls_loss, reg_loss


# ========================================= main ==========================================
def make_annotations(key, bsz, n, num_classes, img_size):
    kx, ky, kw, kh, kc = jax.random.split(key, 5)
    x1 = jax.random.uniform(kx, (bsz, n), minval=0.0, maxval=img_size * 0.6)
    y1 = jax.random.uniform(ky, (bsz, n), minval=0.0, maxval=img_size * 0.6)
    bw = jax.random.uniform(kw, (bsz, n), minval=2.0, maxval=6.0)
    bh = jax.random.uniform(kh, (bsz, n), minval=2.0, maxval=6.0)
    cls = jax.random.randint(kc, (bsz, n), 0, num_classes).astype(jnp.float32)
    ann = jnp.stack([x1, y1, x1 + bw, y1 + bh, cls], axis=-1)                 # [B, N, 5]
    n_valid = jnp.array([3, 5])                                               # per-image valid count
    mask = jnp.arange(n)[None, :] < n_valid[:, None]
    return jnp.where(mask[..., None], ann, -1.0).astype(jnp.float32)


if __name__ == "__main__":
    key = jax.random.PRNGKey(0)
    k_params, k_imgs, k_ann = jax.random.split(key, 3)

    params = init_params(k_params)
    imgs = jax.random.normal(k_imgs, (B, C_IN, H, W), jnp.float32)
    annotations = make_annotations(k_ann, B, NUM_ANNOTS, NUM_CLASSES, float(H))

    cls_loss, reg_loss = jax.jit(model_with_loss)(params, imgs, annotations)
    jax.block_until_ready((cls_loss, reg_loss))
    print("KERNEL_OK")
</pallas_src>

<mosaic_0001>
module attributes {stable_mosaic.version = 11 : i64} {
  func.func @fused_model_loss_kernel(%arg0: i32, %arg1: memref<1x8x256xf32, #tpu.memory_space<vmem>>, %arg2: memref<32x8xf32, #tpu.memory_space<vmem>>, %arg3: memref<32x1xf32, #tpu.memory_space<vmem>>, %arg4: memref<16x32xf32, #tpu.memory_space<vmem>>, %arg5: memref<16x1xf32, #tpu.memory_space<vmem>>, %arg6: memref<8x256xf32, #tpu.memory_space<vmem>>, %arg7: memref<2x8x5xf32, #tpu.memory_space<smem>>, %arg8: memref<1x1x128xf32, #tpu.memory_space<vmem>>) attributes {dimension_semantics = [#tpu.dimension_semantics<parallel>], iteration_bounds = array<i64: 2>, scalar_prefetch = 0 : i64, scratch_operands = 0 : i64, tpu.core_type = #tpu.core_type<tc>, window_params = [{transform_indices = @transform_0, window_bounds = array<i64: 1, 8, 256>}, {pipeline_mode = #tpu.pipeline_mode<synchronous>, transform_indices = @transform_1, window_bounds = array<i64: 32, 8>}, {pipeline_mode = #tpu.pipeline_mode<synchronous>, transform_indices = @transform_2, window_bounds = array<i64: 32, 1>}, {pipeline_mode = #tpu.pipeline_mode<synchronous>, transform_indices = @transform_3, window_bounds = array<i64: 16, 32>}, {pipeline_mode = #tpu.pipeline_mode<synchronous>, transform_indices = @transform_4, window_bounds = array<i64: 16, 1>}, {pipeline_mode = #tpu.pipeline_mode<synchronous>, transform_indices = @transform_5, window_bounds = array<i64: 8, 256>}, {transform_indices = @transform_6, window_bounds = array<i64: 2, 8, 5>}, {transform_indices = @transform_7, window_bounds = array<i64: 1, 1, 128>}]} {
    %c0 = arith.constant 0 : index
    %c0_0 = arith.constant 0 : index
    %c0_1 = arith.constant 0 : index
    %0 = vector.load %arg1[%c0, %c0_0, %c0_1] : memref<1x8x256xf32, #tpu.memory_space<vmem>>, vector<1x8x256xf32>
    %1 = vector.shape_cast %0 : vector<1x8x256xf32> to vector<8x256xf32>
    %c0_2 = arith.constant 0 : index
    %c0_3 = arith.constant 0 : index
    %2 = vector.load %arg2[%c0_2, %c0_3] : memref<32x8xf32, #tpu.memory_space<vmem>>, vector<32x8xf32>
    %cst = arith.constant dense<0.000000e+00> : vector<32x256xf32>
    %3 = tpu.matmul %2, %1, %cst {dimension_numbers = #tpu.dot_dimension_numbers<[1], [0], [0], [1], [0, 0, 1, 1], [], []>} : vector<32x8xf32>, vector<8x256xf32>, vector<32x256xf32> -> vector<32x256xf32>
    %c0_4 = arith.constant 0 : index
    %c0_5 = arith.constant 0 : index
    %4 = vector.load %arg3[%c0_4, %c0_5] : memref<32x1xf32, #tpu.memory_space<vmem>>, vector<32x1xf32>
    %5 = vector.broadcast %4 : vector<32x1xf32> to vector<32x256xf32>
    %6 = arith.addf %3, %5 : vector<32x256xf32>
    %cst_6 = arith.constant 0.000000e+00 : f32
    %7 = vector.broadcast %cst_6 : f32 to vector<32x256xf32>
    %8 = arith.maximumf %6, %7 : vector<32x256xf32>
    %c0_7 = arith.constant 0 : index
    %c0_8 = arith.constant 0 : index
    %9 = vector.load %arg4[%c0_7, %c0_8] : memref<16x32xf32, #tpu.memory_space<vmem>>, vector<16x32xf32>
    %cst_9 = arith.constant dense<0.000000e+00> : vector<16x256xf32>
    %10 = tpu.matmul %9, %8, %cst_9 {dimension_numbers = #tpu.dot_dimension_numbers<[1], [0], [0], [1], [0, 0, 1, 1], [], []>} : vector<16x32xf32>, vector<32x256xf32>, vector<16x256xf32> -> vector<16x256xf32>
    %c0_10 = arith.constant 0 : index
    %c0_11 = arith.constant 0 : index
    %11 = vector.load %arg5[%c0_10, %c0_11] : memref<16x1xf32, #tpu.memory_space<vmem>>, vector<16x1xf32>
    %12 = vector.broadcast %11 : vector<16x1xf32> to vector<16x256xf32>
    %13 = arith.addf %10, %12 : vector<16x256xf32>
    %14 = vector.extract_strided_slice %13 {offsets = [0, 0], sizes = [8, 256], strides = [1, 1]} : vector<16x256xf32> to vector<8x256xf32>
    %15 = vector.extract_strided_slice %13 {offsets = [8, 0], sizes = [1, 256], strides = [1, 1]} : vector<16x256xf32> to vector<1x256xf32>
    %16 = vector.extract_strided_slice %13 {offsets = [9, 0], sizes = [1, 256], strides = [1, 1]} : vector<16x256xf32> to vector<1x256xf32>
    %17 = vector.extract_strided_slice %13 {offsets = [10, 0], sizes = [1, 256], strides = [1, 1]} : vector<16x256xf32> to vector<1x256xf32>
    %18 = vector.extract_strided_slice %13 {offsets = [11, 0], sizes = [1, 256], strides = [1, 1]} : vector<16x256xf32> to vector<1x256xf32>
    %c0_12 = arith.constant 0 : index
    %c0_13 = arith.constant 0 : index
    %19 = vector.load %arg6[%c0_12, %c0_13] : memref<8x256xf32, #tpu.memory_space<vmem>>, vector<1x256xf32>
    %c1 = arith.constant 1 : index
    %c0_14 = arith.constant 0 : index
    %20 = vector.load %arg6[%c1, %c0_14] : memref<8x256xf32, #tpu.memory_space<vmem>>, vector<1x256xf32>
    %c2 = arith.constant 2 : index
    %c0_15 = arith.constant 0 : index
    %21 = vector.load %arg6[%c2, %c0_15] : memref<8x256xf32, #tpu.memory_space<vmem>>, vector<1x256xf32>
    %c3 = arith.constant 3 : index
    %c0_16 = arith.constant 0 : index
    %22 = vector.load %arg6[%c3, %c0_16] : memref<8x256xf32, #tpu.memory_space<vmem>>, vector<1x256xf32>
    %c4 = arith.constant 4 : index
    %c0_17 = arith.constant 0 : index
    %23 = vector.load %arg6[%c4, %c0_17] : memref<8x256xf32, #tpu.memory_space<vmem>>, vector<1x256xf32>
    %c5 = arith.constant 5 : index
    %c0_18 = arith.constant 0 : index
    %24 = vector.load %arg6[%c5, %c0_18] : memref<8x256xf32, #tpu.memory_space<vmem>>, vector<1x256xf32>
    %c6 = arith.constant 6 : index
    %c0_19 = arith.constant 0 : index
    %25 = vector.load %arg6[%c6, %c0_19] : memref<8x256xf32, #tpu.memory_space<vmem>>, vector<1x256xf32>
    %c7 = arith.constant 7 : index
    %c0_20 = arith.constant 0 : index
    %26 = vector.load %arg6[%c7, %c0_20] : memref<8x256xf32, #tpu.memory_space<vmem>>, vector<1x256xf32>
    %27 = arith.mulf %23, %24 : vector<1x256xf32>
    %cst_21 = arith.constant -1.000000e+00 : f32
    %28 = vector.broadcast %cst_21 : f32 to vector<1x256xf32>
    %cst_22 = arith.constant 0.000000e+00 : f32
    %29 = vector.broadcast %cst_22 : f32 to vector<1x256xf32>
    %cst_23 = arith.constant 0.000000e+00 : f32
    %30 = vector.broadcast %cst_23 : f32 to vector<1x256xf32>
    %cst_24 = arith.constant 0.000000e+00 : f32
    %31 = vector.broadcast %cst_24 : f32 to vector<1x256xf32>
    %cst_25 = arith.constant 0.000000e+00 : f32
    %32 = vector.broadcast %cst_25 : f32 to vector<1x256xf32>
    %cst_26 = arith.constant -1.000000e+00 : f32
    %33 = vector.broadcast %cst_26 : f32 to vector<1x256xf32>
    %34 = arith.index_cast %arg0 : i32 to index
    %c0_27 = arith.constant 0 : index
    %c0_28 = arith.constant 0 : index
    %35 = memref.load %arg7[%34, %c0_27, %c0_28] : memref<2x8x5xf32, #tpu.memory_space<smem>>
    %36 = arith.index_cast %arg0 : i32 to index
    %c0_29 = arith.constant 0 : index
    %c1_30 = arith.constant 1 : index
    %37 = memref.load %arg7[%36, %c0_29, %c1_30] : memref<2x8x5xf32, #tpu.memory_space<smem>>
    %38 = arith.index_cast %arg0 : i32 to index
    %c0_31 = arith.constant 0 : index
    %c2_32 = arith.constant 2 : index
    %39 = memref.load %arg7[%38, %c0_31, %c2_32] : memref<2x8x5xf32, #tpu.memory_space<smem>>
    %40 = arith.index_cast %arg0 : i32 to index
    %c0_33 = arith.constant 0 : index
    %c3_34 = arith.constant 3 : index
    %41 = memref.load %arg7[%40, %c0_33, %c3_34] : memref<2x8x5xf32, #tpu.memory_space<smem>>
    %42 = arith.index_cast %arg0 : i32 to index
    %c0_35 = arith.constant 0 : index
    %c4_36 = arith.constant 4 : index
    %43 = memref.load %arg7[%42, %c0_35, %c4_36] : memref<2x8x5xf32, #tpu.memory_space<smem>>
    %cst_37 = arith.constant -1.000000e+00 : f32
    %44 = arith.cmpf one, %43, %cst_37 : f32
    %45 = arith.subf %39, %35 : f32
    %46 = arith.subf %41, %37 : f32
    %47 = arith.mulf %45, %46 : f32
    %48 = vector.broadcast %39 : f32 to vector<1x256xf32>
    %49 = arith.minimumf %22, %48 : vector<1x256xf32>
    %50 = vector.broadcast %35 : f32 to vector<1x256xf32>
    %51 = arith.maximumf %20, %50 : vector<1x256xf32>
    %52 = arith.subf %49, %51 : vector<1x256xf32>
    %cst_38 = arith.constant 0.000000e+00 : f32
    %53 = vector.broadcast %cst_38 : f32 to vector<1x256xf32>
    %54 = arith.maximumf %52, %53 : vector<1x256xf32>
    %55 = vector.broadcast %41 : f32 to vector<1x256xf32>
    %56 = arith.minimumf %21, %55 : vector<1x256xf32>
    %57 = vector.broadcast %37 : f32 to vector<1x256xf32>
    %58 = arith.maximumf %19, %57 : vector<1x256xf32>
    %59 = arith.subf %56, %58 : vector<1x256xf32>
    %cst_39 = arith.constant 0.000000e+00 : f32
    %60 = vector.broadcast %cst_39 : f32 to vector<1x256xf32>
    %61 = arith.maximumf %59, %60 : vector<1x256xf32>
    %62 = arith.mulf %54, %61 : vector<1x256xf32>
    %63 = vector.broadcast %47 : f32 to vector<1x256xf32>
    %64 = arith.addf %27, %63 : vector<1x256xf32>
    %65 = arith.subf %64, %62 : vector<1x256xf32>
    %cst_40 = arith.constant 9.99999993E-9 : f32
    %66 = vector.broadcast %cst_40 : f32 to vector<1x256xf32>
    %67 = arith.maximumf %65, %66 : vector<1x256xf32>
    %68 = arith.divf %62, %67 : vector<1x256xf32>
    %cst_41 = arith.constant -1.000000e+00 : f32
    %69 = vector.broadcast %cst_41 : f32 to vector<1x256xf32>
    %70 = arith.select %44, %68, %69 : vector<1x256xf32>
    %71 = arith.cmpf ogt, %70, %28 : vector<1x256xf32>
    %72 = arith.select %71, %70, %28 : vector<1x256xi1>, vector<1x256xf32>
    %73 = vector.broadcast %35 : f32 to vector<1x256xf32>
    %74 = arith.select %71, %73, %29 : vector<1x256xi1>, vector<1x256xf32>
    %75 = vector.broadcast %37 : f32 to vector<1x256xf32>
    %76 = arith.select %71, %75, %30 : vector<1x256xi1>, vector<1x256xf32>
    %77 = vector.broadcast %39 : f32 to vector<1x256xf32>
    %78 = arith.select %71, %77, %31 : vector<1x256xi1>, vector<1x256xf32>
    %79 = vector.broadcast %41 : f32 to vector<1x256xf32>
    %80 = arith.select %71, %79, %32 : vector<1x256xi1>, vector<1x256xf32>
    %81 = vector.broadcast %43 : f32 to vector<1x256xf32>
    %82 = arith.select %71, %81, %33 : vector<1x256xi1>, vector<1x256xf32>
    %83 = arith.index_cast %arg0 : i32 to index
    %c1_42 = arith.constant 1 : index
    %c0_43 = arith.constant 0 : index
    %84 = memref.load %arg7[%83, %c1_42, %c0_43] : memref<2x8x5xf32, #tpu.memory_space<smem>>
    %85 = arith.index_cast %arg0 : i32 to index
    %c1_44 = arith.constant 1 : index
    %c1_45 = arith.constant 1 : index
    %86 = memref.load %arg7[%85, %c1_44, %c1_45] : memref<2x8x5xf32, #tpu.memory_space<smem>>
    %87 = arith.index_cast %arg0 : i32 to index
    %c1_46 = arith.constant 1 : index
    %c2_47 = arith.constant 2 : index
    %88 = memref.load %arg7[%87, %c1_46, %c2_47] : memref<2x8x5xf32, #tpu.memory_space<smem>>
    %89 = arith.index_cast %arg0 : i32 to index
    %c1_48 = arith.constant 1 : index
    %c3_49 = arith.constant 3 : index
    %90 = memref.load %arg7[%89, %c1_48, %c3_49] : memref<2x8x5xf32, #tpu.memory_space<smem>>
    %91 = arith.index_cast %arg0 : i32 to index
    %c1_50 = arith.constant 1 : index
    %c4_51 = arith.constant 4 : index
    %92 = memref.load %arg7[%91, %c1_50, %c4_51] : memref<2x8x5xf32, #tpu.memory_space<smem>>
    %cst_52 = arith.constant -1.000000e+00 : f32
    %93 = arith.cmpf one, %92, %cst_52 : f32
    %94 = arith.subf %88, %84 : f32
    %95 = arith.subf %90, %86 : f32
    %96 = arith.mulf %94, %95 : f32
    %97 = vector.broadcast %88 : f32 to vector<1x256xf32>
    %98 = arith.minimumf %22, %97 : vector<1x256xf32>
    %99 = vector.broadcast %84 : f32 to vector<1x256xf32>
    %100 = arith.maximumf %20, %99 : vector<1x256xf32>
    %101 = arith.subf %98, %100 : vector<1x256xf32>
    %cst_53 = arith.constant 0.000000e+00 : f32
    %102 = vector.broadcast %cst_53 : f32 to vector<1x256xf32>
    %103 = arith.maximumf %101, %102 : vector<1x256xf32>
    %104 = vector.broadcast %90 : f32 to vector<1x256xf32>
    %105 = arith.minimumf %21, %104 : vector<1x256xf32>
    %106 = vector.broadcast %86 : f32 to vector<1x256xf32>
    %107 = arith.maximumf %19, %106 : vector<1x256xf32>
    %108 = arith.subf %105, %107 : vector<1x256xf32>
    %cst_54 = arith.constant 0.000000e+00 : f32
    %109 = vector.broadcast %cst_54 : f32 to vector<1x256xf32>
    %110 = arith.maximumf %108, %109 : vector<1x256xf32>
    %111 = arith.mulf %103, %110 : vector<1x256xf32>
    %112 = vector.broadcast %96 : f32 to vector<1x256xf32>
    %113 = arith.addf %27, %112 : vector<1x256xf32>
    %114 = arith.subf %113, %111 : vector<1x256xf32>
    %cst_55 = arith.constant 9.99999993E-9 : f32
    %115 = vector.broadcast %cst_55 : f32 to vector<1x256xf32>
    %116 = arith.maximumf %114, %115 : vector<1x256xf32>
    %117 = arith.divf %111, %116 : vector<1x256xf32>
    %cst_56 = arith.constant -1.000000e+00 : f32
    %118 = vector.broadcast %cst_56 : f32 to vector<1x256xf32>
    %119 = arith.select %93, %117, %118 : vector<1x256xf32>
    %120 = arith.cmpf ogt, %119, %72 : vector<1x256xf32>
    %121 = arith.select %120, %119, %72 : vector<1x256xi1>, vector<1x256xf32>
    %122 = vector.broadcast %84 : f32 to vector<1x256xf32>
    %123 = arith.select %120, %122, %74 : vector<1x256xi1>, vector<1x256xf32>
    %124 = vector.broadcast %86 : f32 to vector<1x256xf32>
    %125 = arith.select %120, %124, %76 : vector<1x256xi1>, vector<1x256xf32>
    %126 = vector.broadcast %88 : f32 to vector<1x256xf32>
    %127 = arith.select %120, %126, %78 : vector<1x256xi1>, vector<1x256xf32>
    %128 = vector.broadcast %90 : f32 to vector<1x256xf32>
    %129 = arith.select %120, %128, %80 : vector<1x256xi1>, vector<1x256xf32>
    %130 = vector.broadcast %92 : f32 to vector<1x256xf32>
    %131 = arith.select %120, %130, %82 : vector<1x256xi1>, vector<1x256xf32>
    %132 = arith.index_cast %arg0 : i32 to index
    %c2_57 = arith.constant 2 : index
    %c0_58 = arith.constant 0 : index
    %133 = memref.load %arg7[%132, %c2_57, %c0_58] : memref<2x8x5xf32, #tpu.memory_space<smem>>
    %134 = arith.index_cast %arg0 : i32 to index
    %c2_59 = arith.constant 2 : index
    %c1_60 = arith.constant 1 : index
    %135 = memref.load %arg7[%134, %c2_59, %c1_60] : memref<2x8x5xf32, #tpu.memory_space<smem>>
    %136 = arith.index_cast %arg0 : i32 to index
    %c2_61 = arith.constant 2 : index
    %c2_62 = arith.constant 2 : index
    %137 = memref.load %arg7[%136, %c2_61, %c2_62] : memref<2x8x5xf32, #tpu.memory_space<smem>>
    %138 = arith.index_cast %arg0 : i32 to index
    %c2_63 = arith.constant 2 : index
    %c3_64 = arith.constant 3 : index
    %139 = memref.load %arg7[%138, %c2_63, %c3_64] : memref<2x8x5xf32, #tpu.memory_space<smem>>
    %140 = arith.index_cast %arg0 : i32 to index
    %c2_65 = arith.constant 2 : index
    %c4_66 = arith.constant 4 : index
    %141 = memref.load %arg7[%140, %c2_65, %c4_66] : memref<2x8x5xf32, #tpu.memory_space<smem>>
    %cst_67 = arith.constant -1.000000e+00 : f32
    %142 = arith.cmpf one, %141, %cst_67 : f32
    %143 = arith.subf %137, %133 : f32
    %144 = arith.subf %139, %135 : f32
    %145 = arith.mulf %143, %144 : f32
    %146 = vector.broadcast %137 : f32 to vector<1x256xf32>
    %147 = arith.minimumf %22, %146 : vector<1x256xf32>
    %148 = vector.broadcast %133 : f32 to vector<1x256xf32>
    %149 = arith.maximumf %20, %148 : vector<1x256xf32>
    %150 = arith.subf %147, %149 : vector<1x256xf32>
    %cst_68 = arith.constant 0.000000e+00 : f32
    %151 = vector.broadcast %cst_68 : f32 to vector<1x256xf32>
    %152 = arith.maximumf %150, %151 : vector<1x256xf32>
    %153 = vector.broadcast %139 : f32 to vector<1x256xf32>
    %154 = arith.minimumf %21, %153 : vector<1x256xf32>
    %155 = vector.broadcast %135 : f32 to vector<1x256xf32>
    %156 = arith.maximumf %19, %155 : vector<1x256xf32>
    %157 = arith.subf %154, %156 : vector<1x256xf32>
    %cst_69 = arith.constant 0.000000e+00 : f32
    %158 = vector.broadcast %cst_69 : f32 to vector<1x256xf32>
    %159 = arith.maximumf %157, %158 : vector<1x256xf32>
    %160 = arith.mulf %152, %159 : vector<1x256xf32>
    %161 = vector.broadcast %145 : f32 to vector<1x256xf32>
    %162 = arith.addf %27, %161 : vector<1x256xf32>
    %163 = arith.subf %162, %160 : vector<1x256xf32>
    %cst_70 = arith.constant 9.99999993E-9 : f32
    %164 = vector.broadcast %cst_70 : f32 to vector<1x256xf32>
    %165 = arith.maximumf %163, %164 : vector<1x256xf32>
    %166 = arith.divf %160, %165 : vector<1x256xf32>
    %cst_71 = arith.constant -1.000000e+00 : f32
    %167 = vector.broadcast %cst_71 : f32 to vector<1x256xf32>
    %168 = arith.select %142, %166, %167 : vector<1x256xf32>
    %169 = arith.cmpf ogt, %168, %121 : vector<1x256xf32>
    %170 = arith.select %169, %168, %121 : vector<1x256xi1>, vector<1x256xf32>
    %171 = vector.broadcast %133 : f32 to vector<1x256xf32>
    %172 = arith.select %169, %171, %123 : vector<1x256xi1>, vector<1x256xf32>
    %173 = vector.broadcast %135 : f32 to vector<1x256xf32>
    %174 = arith.select %169, %173, %125 : vector<1x256xi1>, vector<1x256xf32>
    %175 = vector.broadcast %137 : f32 to vector<1x256xf32>
    %176 = arith.select %169, %175, %127 : vector<1x256xi1>, vector<1x256xf32>
    %177 = vector.broadcast %139 : f32 to vector<1x256xf32>
    %178 = arith.select %169, %177, %129 : vector<1x256xi1>, vector<1x256xf32>
    %179 = vector.broadcast %141 : f32 to vector<1x256xf32>
    %180 = arith.select %169, %179, %131 : vector<1x256xi1>, vector<1x256xf32>
    %181 = arith.index_cast %arg0 : i32 to index
    %c3_72 = arith.constant 3 : index
    %c0_73 = arith.constant 0 : index
    %182 = memref.load %arg7[%181, %c3_72, %c0_73] : memref<2x8x5xf32, #tpu.memory_space<smem>>
    %183 = arith.index_cast %arg0 : i32 to index
    %c3_74 = arith.constant 3 : index
    %c1_75 = arith.constant 1 : index
    %184 = memref.load %arg7[%183, %c3_74, %c1_75] : memref<2x8x5xf32, #tpu.memory_space<smem>>
    %185 = arith.index_cast %arg0 : i32 to index
    %c3_76 = arith.constant 3 : index
    %c2_77 = arith.constant 2 : index
    %186 = memref.load %arg7[%185, %c3_76, %c2_77] : memref<2x8x5xf32, #tpu.memory_space<smem>>
    %187 = arith.index_cast %arg0 : i32 to index
    %c3_78 = arith.constant 3 : index
    %c3_79 = arith.constant 3 : index
    %188 = memref.load %arg7[%187, %c3_78, %c3_79] : memref<2x8x5xf32, #tpu.memory_space<smem>>
    %189 = arith.index_cast %arg0 : i32 to index
    %c3_80 = arith.constant 3 : index
    %c4_81 = arith.constant 4 : index
    %190 = memref.load %arg7[%189, %c3_80, %c4_81] : memref<2x8x5xf32, #tpu.memory_space<smem>>
    %cst_82 = arith.constant -1.000000e+00 : f32
    %191 = arith.cmpf one, %190, %cst_82 : f32
    %192 = arith.subf %186, %182 : f32
    %193 = arith.subf %188, %184 : f32
    %194 = arith.mulf %192, %193 : f32
    %195 = vector.broadcast %186 : f32 to vector<1x256xf32>
    %196 = arith.minimumf %22, %195 : vector<1x256xf32>
    %197 = vector.broadcast %182 : f32 to vector<1x256xf32>
    %198 = arith.maximumf %20, %197 : vector<1x256xf32>
    %199 = arith.subf %196, %198 : vector<1x256xf32>
    %cst_83 = arith.constant 0.000000e+00 : f32
    %200 = vector.broadcast %cst_83 : f32 to vector<1x256xf32>
    %201 = arith.maximumf %199, %200 : vector<1x256xf32>
    %202 = vector.broadcast %188 : f32 to vector<1x256xf32>
    %203 = arith.minimumf %21, %202 : vector<1x256xf32>
    %204 = vector.broadcast %184 : f32 to vector<1x256xf32>
    %205 = arith.maximumf %19, %204 : vector<1x256xf32>
    %206 = arith.subf %203, %205 : vector<1x256xf32>
    %cst_84 = arith.constant 0.000000e+00 : f32
    %207 = vector.broadcast %cst_84 : f32 to vector<1x256xf32>
    %208 = arith.maximumf %206, %207 : vector<1x256xf32>
    %209 = arith.mulf %201, %208 : vector<1x256xf32>
    %210 = vector.broadcast %194 : f32 to vector<1x256xf32>
    %211 = arith.addf %27, %210 : vector<1x256xf32>
    %212 = arith.subf %211, %209 : vector<1x256xf32>
    %cst_85 = arith.constant 9.99999993E-9 : f32
    %213 = vector.broadcast %cst_85 : f32 to vector<1x256xf32>
    %214 = arith.maximumf %212, %213 : vector<1x256xf32>
    %215 = arith.divf %209, %214 : vector<1x256xf32>
    %cst_86 = arith.constant -1.000000e+00 : f32
    %216 = vector.broadcast %cst_86 : f32 to vector<1x256xf32>
    %217 = arith.select %191, %215, %216 : vector<1x256xf32>
    %218 = arith.cmpf ogt, %217, %170 : vector<1x256xf32>
    %219 = arith.select %218, %217, %170 : vector<1x256xi1>, vector<1x256xf32>
    %220 = vector.broadcast %182 : f32 to vector<1x256xf32>
    %221 = arith.select %218, %220, %172 : vector<1x256xi1>, vector<1x256xf32>
    %222 = vector.broadcast %184 : f32 to vector<1x256xf32>
    %223 = arith.select %218, %222, %174 : vector<1x256xi1>, vector<1x256xf32>
    %224 = vector.broadcast %186 : f32 to vector<1x256xf32>
    %225 = arith.select %218, %224, %176 : vector<1x256xi1>, vector<1x256xf32>
    %226 = vector.broadcast %188 : f32 to vector<1x256xf32>
    %227 = arith.select %218, %226, %178 : vector<1x256xi1>, vector<1x256xf32>
    %228 = vector.broadcast %190 : f32 to vector<1x256xf32>
    %229 = arith.select %218, %228, %180 : vector<1x256xi1>, vector<1x256xf32>
    %230 = arith.index_cast %arg0 : i32 to index
    %c4_87 = arith.constant 4 : index
    %c0_88 = arith.constant 0 : index
    %231 = memref.load %arg7[%230, %c4_87, %c0_88] : memref<2x8x5xf32, #tpu.memory_space<smem>>
    %232 = arith.index_cast %arg0 : i32 to index
    %c4_89 = arith.constant 4 : index
    %c1_90 = arith.constant 1 : index
    %233 = memref.load %arg7[%232, %c4_89, %c1_90] : memref<2x8x5xf32, #tpu.memory_space<smem>>
    %234 = arith.index_cast %arg0 : i32 to index
    %c4_91 = arith.constant 4 : index
    %c2_92 = arith.constant 2 : index
    %235 = memref.load %arg7[%234, %c4_91, %c2_92] : memref<2x8x5xf32, #tpu.memory_space<smem>>
    %236 = arith.index_cast %arg0 : i32 to index
    %c4_93 = arith.constant 4 : index
    %c3_94 = arith.constant 3 : index
    %237 = memref.load %arg7[%236, %c4_93, %c3_94] : memref<2x8x5xf32, #tpu.memory_space<smem>>
    %238 = arith.index_cast %arg0 : i32 to index
    %c4_95 = arith.constant 4 : index
    %c4_96 = arith.constant 4 : index
    %239 = memref.load %arg7[%238, %c4_95, %c4_96] : memref<2x8x5xf32, #tpu.memory_space<smem>>
    %cst_97 = arith.constant -1.000000e+00 : f32
    %240 = arith.cmpf one, %239, %cst_97 : f32
    %241 = arith.subf %235, %231 : f32
    %242 = arith.subf %237, %233 : f32
    %243 = arith.mulf %241, %242 : f32
    %244 = vector.broadcast %235 : f32 to vector<1x256xf32>
    %245 = arith.minimumf %22, %244 : vector<1x256xf32>
    %246 = vector.broadcast %231 : f32 to vector<1x256xf32>
    %247 = arith.maximumf %20, %246 : vector<1x256xf32>
    %248 = arith.subf %245, %247 : vector<1x256xf32>
    %cst_98 = arith.constant 0.000000e+00 : f32
    %249 = vector.broadcast %cst_98 : f32 to vector<1x256xf32>
    %250 = arith.maximumf %248, %249 : vector<1x256xf32>
    %251 = vector.broadcast %237 : f32 to vector<1x256xf32>
    %252 = arith.minimumf %21, %251 : vector<1x256xf32>
    %253 = vector.broadcast %233 : f32 to vector<1x256xf32>
    %254 = arith.maximumf %19, %253 : vector<1x256xf32>
    %255 = arith.subf %252, %254 : vector<1x256xf32>
    %cst_99 = arith.constant 0.000000e+00 : f32
    %256 = vector.broadcast %cst_99 : f32 to vector<1x256xf32>
    %257 = arith.maximumf %255, %256 : vector<1x256xf32>
    %258 = arith.mulf %250, %257 : vector<1x256xf32>
    %259 = vector.broadcast %243 : f32 to vector<1x256xf32>
    %260 = arith.addf %27, %259 : vector<1x256xf32>
    %261 = arith.subf %260, %258 : vector<1x256xf32>
    %cst_100 = arith.constant 9.99999993E-9 : f32
    %262 = vector.broadcast %cst_100 : f32 to vector<1x256xf32>
    %263 = arith.maximumf %261, %262 : vector<1x256xf32>
    %264 = arith.divf %258, %263 : vector<1x256xf32>
    %cst_101 = arith.constant -1.000000e+00 : f32
    %265 = vector.broadcast %cst_101 : f32 to vector<1x256xf32>
    %266 = arith.select %240, %264, %265 : vector<1x256xf32>
    %267 = arith.cmpf ogt, %266, %219 : vector<1x256xf32>
    %268 = arith.select %267, %266, %219 : vector<1x256xi1>, vector<1x256xf32>
    %269 = vector.broadcast %231 : f32 to vector<1x256xf32>
    %270 = arith.select %267, %269, %221 : vector<1x256xi1>, vector<1x256xf32>
    %271 = vector.broadcast %233 : f32 to vector<1x256xf32>
    %272 = arith.select %267, %271, %223 : vector<1x256xi1>, vector<1x256xf32>
    %273 = vector.broadcast %235 : f32 to vector<1x256xf32>
    %274 = arith.select %267, %273, %225 : vector<1x256xi1>, vector<1x256xf32>
    %275 = vector.broadcast %237 : f32 to vector<1x256xf32>
    %276 = arith.select %267, %275, %227 : vector<1x256xi1>, vector<1x256xf32>
    %277 = vector.broadcast %239 : f32 to vector<1x256xf32>
    %278 = arith.select %267, %277, %229 : vector<1x256xi1>, vector<1x256xf32>
    %279 = arith.index_cast %arg0 : i32 to index
    %c5_102 = arith.constant 5 : index
    %c0_103 = arith.constant 0 : index
    %280 = memref.load %arg7[%279, %c5_102, %c0_103] : memref<2x8x5xf32, #tpu.memory_space<smem>>
    %281 = arith.index_cast %arg0 : i32 to index
    %c5_104 = arith.constant 5 : index
    %c1_105 = arith.constant 1 : index
    %282 = memref.load %arg7[%281, %c5_104, %c1_105] : memref<2x8x5xf32, #tpu.memory_space<smem>>
    %283 = arith.index_cast %arg0 : i32 to index
    %c5_106 = arith.constant 5 : index
    %c2_107 = arith.constant 2 : index
    %284 = memref.load %arg7[%283, %c5_106, %c2_107] : memref<2x8x5xf32, #tpu.memory_space<smem>>
    %285 = arith.index_cast %arg0 : i32 to index
    %c5_108 = arith.constant 5 : index
    %c3_109 = arith.constant 3 : index
    %286 = memref.load %arg7[%285, %c5_108, %c3_109] : memref<2x8x5xf32, #tpu.memory_space<smem>>
    %287 = arith.index_cast %arg0 : i32 to index
    %c5_110 = arith.constant 5 : index
    %c4_111 = arith.constant 4 : index
    %288 = memref.load %arg7[%287, %c5_110, %c4_111] : memref<2x8x5xf32, #tpu.memory_space<smem>>
    %cst_112 = arith.constant -1.000000e+00 : f32
    %289 = arith.cmpf one, %288, %cst_112 : f32
    %290 = arith.subf %284, %280 : f32
    %291 = arith.subf %286, %282 : f32
    %292 = arith.mulf %290, %291 : f32
    %293 = vector.broadcast %284 : f32 to vector<1x256xf32>
    %294 = arith.minimumf %22, %293 : vector<1x256xf32>
    %295 = vector.broadcast %280 : f32 to vector<1x256xf32>
    %296 = arith.maximumf %20, %295 : vector<1x256xf32>
    %297 = arith.subf %294, %296 : vector<1x256xf32>
    %cst_113 = arith.constant 0.000000e+00 : f32
    %298 = vector.broadcast %cst_113 : f32 to vector<1x256xf32>
    %299 = arith.maximumf %297, %298 : vector<1x256xf32>
    %300 = vector.broadcast %286 : f32 to vector<1x256xf32>
    %301 = arith.minimumf %21, %300 : vector<1x256xf32>
    %302 = vector.broadcast %282 : f32 to vector<1x256xf32>
    %303 = arith.maximumf %19, %302 : vector<1x256xf32>
    %304 = arith.subf %301, %303 : vector<1x256xf32>
    %cst_114 = arith.constant 0.000000e+00 : f32
    %305 = vector.broadcast %cst_114 : f32 to vector<1x256xf32>
    %306 = arith.maximumf %304, %305 : vector<1x256xf32>
    %307 = arith.mulf %299, %306 : vector<1x256xf32>
    %308 = vector.broadcast %292 : f32 to vector<1x256xf32>
    %309 = arith.addf %27, %308 : vector<1x256xf32>
    %310 = arith.subf %309, %307 : vector<1x256xf32>
    %cst_115 = arith.constant 9.99999993E-9 : f32
    %311 = vector.broadcast %cst_115 : f32 to vector<1x256xf32>
    %312 = arith.maximumf %310, %311 : vector<1x256xf32>
    %313 = arith.divf %307, %312 : vector<1x256xf32>
    %cst_116 = arith.constant -1.000000e+00 : f32
    %314 = vector.broadcast %cst_116 : f32 to vector<1x256xf32>
    %315 = arith.select %289, %313, %314 : vector<1x256xf32>
    %316 = arith.cmpf ogt, %315, %268 : vector<1x256xf32>
    %317 = arith.select %316, %315, %268 : vector<1x256xi1>, vector<1x256xf32>
    %318 = vector.broadcast %280 : f32 to vector<1x256xf32>
    %319 = arith.select %316, %318, %270 : vector<1x256xi1>, vector<1x256xf32>
    %320 = vector.broadcast %282 : f32 to vector<1x256xf32>
    %321 = arith.select %316, %320, %272 : vector<1x256xi1>, vector<1x256xf32>
    %322 = vector.broadcast %284 : f32 to vector<1x256xf32>
    %323 = arith.select %316, %322, %274 : vector<1x256xi1>, vector<1x256xf32>
    %324 = vector.broadcast %286 : f32 to vector<1x256xf32>
    %325 = arith.select %316, %324, %276 : vector<1x256xi1>, vector<1x256xf32>
    %326 = vector.broadcast %288 : f32 to vector<1x256xf32>
    %327 = arith.select %316, %326, %278 : vector<1x256xi1>, vector<1x256xf32>
    %328 = arith.index_cast %arg0 : i32 to index
    %c6_117 = arith.constant 6 : index
    %c0_118 = arith.constant 0 : index
    %329 = memref.load %arg7[%328, %c6_117, %c0_118] : memref<2x8x5xf32, #tpu.memory_space<smem>>
    %330 = arith.index_cast %arg0 : i32 to index
    %c6_119 = arith.constant 6 : index
    %c1_120 = arith.constant 1 : index
    %331 = memref.load %arg7[%330, %c6_119, %c1_120] : memref<2x8x5xf32, #tpu.memory_space<smem>>
    %332 = arith.index_cast %arg0 : i32 to index
    %c6_121 = arith.constant 6 : index
    %c2_122 = arith.constant 2 : index
    %333 = memref.load %arg7[%332, %c6_121, %c2_122] : memref<2x8x5xf32, #tpu.memory_space<smem>>
    %334 = arith.index_cast %arg0 : i32 to index
    %c6_123 = arith.constant 6 : index
    %c3_124 = arith.constant 3 : index
    %335 = memref.load %arg7[%334, %c6_123, %c3_124] : memref<2x8x5xf32, #tpu.memory_space<smem>>
    %336 = arith.index_cast %arg0 : i32 to index
    %c6_125 = arith.constant 6 : index
    %c4_126 = arith.constant 4 : index
    %337 = memref.load %arg7[%336, %c6_125, %c4_126] : memref<2x8x5xf32, #tpu.memory_space<smem>>
    %cst_127 = arith.constant -1.000000e+00 : f32
    %338 = arith.cmpf one, %337, %cst_127 : f32
    %339 = arith.subf %333, %329 : f32
    %340 = arith.subf %335, %331 : f32
    %341 = arith.mulf %339, %340 : f32
    %342 = vector.broadcast %333 : f32 to vector<1x256xf32>
    %343 = arith.minimumf %22, %342 : vector<1x256xf32>
    %344 = vector.broadcast %329 : f32 to vector<1x256xf32>
    %345 = arith.maximumf %20, %344 : vector<1x256xf32>
    %346 = arith.subf %343, %345 : vector<1x256xf32>
    %cst_128 = arith.constant 0.000000e+00 : f32
    %347 = vector.broadcast %cst_128 : f32 to vector<1x256xf32>
    %348 = arith.maximumf %346, %347 : vector<1x256xf32>
    %349 = vector.broadcast %335 : f32 to vector<1x256xf32>
    %350 = arith.minimumf %21, %349 : vector<1x256xf32>
    %351 = vector.broadcast %331 : f32 to vector<1x256xf32>
    %352 = arith.maximumf %19, %351 : vector<1x256xf32>
    %353 = arith.subf %350, %352 : vector<1x256xf32>
    %cst_129 = arith.constant 0.000000e+00 : f32
    %354 = vector.broadcast %cst_129 : f32 to vector<1x256xf32>
    %355 = arith.maximumf %353, %354 : vector<1x256xf32>
    %356 = arith.mulf %348, %355 : vector<1x256xf32>
    %357 = vector.broadcast %341 : f32 to vector<1x256xf32>
    %358 = arith.addf %27, %357 : vector<1x256xf32>
    %359 = arith.subf %358, %356 : vector<1x256xf32>
    %cst_130 = arith.constant 9.99999993E-9 : f32
    %360 = vector.broadcast %cst_130 : f32 to vector<1x256xf32>
    %361 = arith.maximumf %359, %360 : vector<1x256xf32>
    %362 = arith.divf %356, %361 : vector<1x256xf32>
    %cst_131 = arith.constant -1.000000e+00 : f32
    %363 = vector.broadcast %cst_131 : f32 to vector<1x256xf32>
    %364 = arith.select %338, %362, %363 : vector<1x256xf32>
    %365 = arith.cmpf ogt, %364, %317 : vector<1x256xf32>
    %366 = arith.select %365, %364, %317 : vector<1x256xi1>, vector<1x256xf32>
    %367 = vector.broadcast %329 : f32 to vector<1x256xf32>
    %368 = arith.select %365, %367, %319 : vector<1x256xi1>, vector<1x256xf32>
    %369 = vector.broadcast %331 : f32 to vector<1x256xf32>
    %370 = arith.select %365, %369, %321 : vector<1x256xi1>, vector<1x256xf32>
    %371 = vector.broadcast %333 : f32 to vector<1x256xf32>
    %372 = arith.select %365, %371, %323 : vector<1x256xi1>, vector<1x256xf32>
    %373 = vector.broadcast %335 : f32 to vector<1x256xf32>
    %374 = arith.select %365, %373, %325 : vector<1x256xi1>, vector<1x256xf32>
    %375 = vector.broadcast %337 : f32 to vector<1x256xf32>
    %376 = arith.select %365, %375, %327 : vector<1x256xi1>, vector<1x256xf32>
    %377 = arith.index_cast %arg0 : i32 to index
    %c7_132 = arith.constant 7 : index
    %c0_133 = arith.constant 0 : index
    %378 = memref.load %arg7[%377, %c7_132, %c0_133] : memref<2x8x5xf32, #tpu.memory_space<smem>>
    %379 = arith.index_cast %arg0 : i32 to index
    %c7_134 = arith.constant 7 : index
    %c1_135 = arith.constant 1 : index
    %380 = memref.load %arg7[%379, %c7_134, %c1_135] : memref<2x8x5xf32, #tpu.memory_space<smem>>
    %381 = arith.index_cast %arg0 : i32 to index
    %c7_136 = arith.constant 7 : index
    %c2_137 = arith.constant 2 : index
    %382 = memref.load %arg7[%381, %c7_136, %c2_137] : memref<2x8x5xf32, #tpu.memory_space<smem>>
    %383 = arith.index_cast %arg0 : i32 to index
    %c7_138 = arith.constant 7 : index
    %c3_139 = arith.constant 3 : index
    %384 = memref.load %arg7[%383, %c7_138, %c3_139] : memref<2x8x5xf32, #tpu.memory_space<smem>>
    %385 = arith.index_cast %arg0 : i32 to index
    %c7_140 = arith.constant 7 : index
    %c4_141 = arith.constant 4 : index
    %386 = memref.load %arg7[%385, %c7_140, %c4_141] : memref<2x8x5xf32, #tpu.memory_space<smem>>
    %cst_142 = arith.constant -1.000000e+00 : f32
    %387 = arith.cmpf one, %386, %cst_142 : f32
    %388 = arith.subf %382, %378 : f32
    %389 = arith.subf %384, %380 : f32
    %390 = arith.mulf %388, %389 : f32
    %391 = vector.broadcast %382 : f32 to vector<1x256xf32>
    %392 = arith.minimumf %22, %391 : vector<1x256xf32>
    %393 = vector.broadcast %378 : f32 to vector<1x256xf32>
    %394 = arith.maximumf %20, %393 : vector<1x256xf32>
    %395 = arith.subf %392, %394 : vector<1x256xf32>
    %cst_143 = arith.constant 0.000000e+00 : f32
    %396 = vector.broadcast %cst_143 : f32 to vector<1x256xf32>
    %397 = arith.maximumf %395, %396 : vector<1x256xf32>
    %398 = vector.broadcast %384 : f32 to vector<1x256xf32>
    %399 = arith.minimumf %21, %398 : vector<1x256xf32>
    %400 = vector.broadcast %380 : f32 to vector<1x256xf32>
    %401 = arith.maximumf %19, %400 : vector<1x256xf32>
    %402 = arith.subf %399, %401 : vector<1x256xf32>
    %cst_144 = arith.constant 0.000000e+00 : f32
    %403 = vector.broadcast %cst_144 : f32 to vector<1x256xf32>
    %404 = arith.maximumf %402, %403 : vector<1x256xf32>
    %405 = arith.mulf %397, %404 : vector<1x256xf32>
    %406 = vector.broadcast %390 : f32 to vector<1x256xf32>
    %407 = arith.addf %27, %406 : vector<1x256xf32>
    %408 = arith.subf %407, %405 : vector<1x256xf32>
    %cst_145 = arith.constant 9.99999993E-9 : f32
    %409 = vector.broadcast %cst_145 : f32 to vector<1x256xf32>
    %410 = arith.maximumf %408, %409 : vector<1x256xf32>
    %411 = arith.divf %405, %410 : vector<1x256xf32>
    %cst_146 = arith.constant -1.000000e+00 : f32
    %412 = vector.broadcast %cst_146 : f32 to vector<1x256xf32>
    %413 = arith.select %387, %411, %412 : vector<1x256xf32>
    %414 = arith.cmpf ogt, %413, %366 : vector<1x256xf32>
    %415 = arith.select %414, %413, %366 : vector<1x256xi1>, vector<1x256xf32>
    %416 = vector.broadcast %378 : f32 to vector<1x256xf32>
    %417 = arith.select %414, %416, %368 : vector<1x256xi1>, vector<1x256xf32>
    %418 = vector.broadcast %380 : f32 to vector<1x256xf32>
    %419 = arith.select %414, %418, %370 : vector<1x256xi1>, vector<1x256xf32>
    %420 = vector.broadcast %382 : f32 to vector<1x256xf32>
    %421 = arith.select %414, %420, %372 : vector<1x256xi1>, vector<1x256xf32>
    %422 = vector.broadcast %384 : f32 to vector<1x256xf32>
    %423 = arith.select %414, %422, %374 : vector<1x256xi1>, vector<1x256xf32>
    %424 = vector.broadcast %386 : f32 to vector<1x256xf32>
    %425 = arith.select %414, %424, %376 : vector<1x256xi1>, vector<1x256xf32>
    %cst_147 = arith.constant 5.000000e-01 : f32
    %426 = vector.broadcast %cst_147 : f32 to vector<1x256xf32>
    %427 = arith.cmpf oge, %415, %426 : vector<1x256xf32>
    %cst_148 = arith.constant 4.000000e-01 : f32
    %428 = vector.broadcast %cst_148 : f32 to vector<1x256xf32>
    %429 = arith.cmpf olt, %415, %428 : vector<1x256xf32>
    %430 = arith.extui %427 : vector<1x256xi1> to vector<1x256xi32>
    %431 = arith.sitofp %430 : vector<1x256xi32> to vector<1x256xf32>
    %432 = vector.shape_cast %431 : vector<1x256xf32> to vector<1x1x256xf32>
    %cst_149 = arith.constant dense<0.000000e+00> : vector<1xf32>
    %433 = vector.multi_reduction <add>, %432, %cst_149 [1, 2] : vector<1x1x256xf32> to vector<1xf32>
    %434 = vector.shape_cast %433 : vector<1xf32> to vector<1x1x1xf32>
    %435 = vector.extract %434[0, 0, 0] : f32 from vector<1x1x1xf32>
    %436 = math.absf %14 : vector<8x256xf32>
    %cst_150 = arith.constant 0.000000e+00 : f32
    %437 = vector.broadcast %cst_150 : f32 to vector<8x256xf32>
    %438 = arith.subf %437, %436 : vector<8x256xf32>
    %439 = math.exp %438 : vector<8x256xf32>
    %cst_151 = arith.constant 1.000000e+00 : f32
    %440 = vector.broadcast %cst_151 : f32 to vector<8x256xf32>
    %441 = arith.addf %440, %439 : vector<8x256xf32>
    %442 = math.log %441 : vector<8x256xf32>
    %cst_152 = arith.constant 0.000000e+00 : f32
    %443 = vector.broadcast %cst_152 : f32 to vector<8x256xf32>
    %444 = arith.minimumf %14, %443 : vector<8x256xf32>
    %445 = arith.subf %444, %442 : vector<8x256xf32>
    %446 = arith.subf %445, %14 : vector<8x256xf32>
    %447 = math.exp %445 : vector<8x256xf32>
    %448 = tpu.iota {dimensions = array<i32: 0>} : vector<8x256xi32>
    %449 = arith.sitofp %448 : vector<8x256xi32> to vector<8x256xf32>
    %450 = vector.broadcast %425 : vector<1x256xf32> to vector<8x256xf32>
    %451 = arith.cmpf oeq, %449, %450 : vector<8x256xf32>
    %452 = arith.extui %451 : vector<8x256xi1> to vector<8x256xi32>
    %453 = arith.sitofp %452 : vector<8x256xi32> to vector<8x256xf32>
    %cst_153 = arith.constant 0.000000e+00 : f32
    %cst_154 = arith.constant -1.000000e+00 : f32
    %454 = vector.broadcast %cst_153 : f32 to vector<1x256xf32>
    %455 = vector.broadcast %cst_154 : f32 to vector<1x256xf32>
    %456 = arith.select %429, %454, %455 : vector<1x256xi1>, vector<1x256xf32>
    %457 = vector.shape_cast %427 : vector<1x256xi1> to vector<1x256xi1>
    %458 = vector.broadcast %457 : vector<1x256xi1> to vector<8x256xi1>
    %459 = vector.shape_cast %456 : vector<1x256xf32> to vector<1x256xf32>
    %460 = vector.broadcast %459 : vector<1x256xf32> to vector<8x256xf32>
    %461 = arith.select %458, %453, %460 : vector<8x256xi1>, vector<8x256xf32>
    %cst_155 = arith.constant 1.000000e+00 : f32
    %462 = vector.broadcast %cst_155 : f32 to vector<8x256xf32>
    %463 = arith.cmpf oeq, %461, %462 : vector<8x256xf32>
    %cst_156 = arith.constant 2.500000e-01 : f32
    %cst_157 = arith.constant 7.500000e-01 : f32
    %464 = vector.broadcast %cst_156 : f32 to vector<8x256xf32>
    %465 = vector.broadcast %cst_157 : f32 to vector<8x256xf32>
    %466 = arith.select %463, %464, %465 : vector<8x256xi1>, vector<8x256xf32>
    %cst_158 = arith.constant 1.000000e+00 : f32
    %467 = vector.broadcast %cst_158 : f32 to vector<8x256xf32>
    %468 = arith.subf %467, %447 : vector<8x256xf32>
    %469 = arith.select %463, %468, %447 : vector<8x256xi1>, vector<8x256xf32>
    %470 = arith.mulf %466, %469 : vector<8x256xf32>
    %471 = arith.mulf %470, %469 : vector<8x256xf32>
    %472 = arith.mulf %461, %445 : vector<8x256xf32>
    %cst_159 = arith.constant 1.000000e+00 : f32
    %473 = vector.broadcast %cst_159 : f32 to vector<8x256xf32>
    %474 = arith.subf %473, %461 : vector<8x256xf32>
    %475 = arith.mulf %474, %446 : vector<8x256xf32>
    %476 = arith.addf %472, %475 : vector<8x256xf32>
    %cst_160 = arith.constant 0.000000e+00 : f32
    %477 = vector.broadcast %cst_160 : f32 to vector<8x256xf32>
    %478 = arith.subf %477, %476 : vector<8x256xf32>
    %cst_161 = arith.constant -1.000000e+00 : f32
    %479 = vector.broadcast %cst_161 : f32 to vector<8x256xf32>
    %480 = arith.cmpf one, %461, %479 : vector<8x256xf32>
    %481 = arith.mulf %471, %478 : vector<8x256xf32>
    %cst_162 = arith.constant 0.000000e+00 : f32
    %482 = vector.broadcast %cst_162 : f32 to vector<8x256xf32>
    %483 = arith.select %480, %481, %482 : vector<8x256xi1>, vector<8x256xf32>
    %484 = vector.shape_cast %483 : vector<8x256xf32> to vector<1x8x256xf32>
    %cst_163 = arith.constant dense<0.000000e+00> : vector<1xf32>
    %485 = vector.multi_reduction <add>, %484, %cst_163 [1, 2] : vector<1x8x256xf32> to vector<1xf32>
    %486 = vector.shape_cast %485 : vector<1xf32> to vector<1x1x1xf32>
    %487 = vector.extract %486[0, 0, 0] : f32 from vector<1x1x1xf32>
    %cst_164 = arith.constant 1.000000e+00 : f32
    %488 = arith.maximumf %435, %cst_164 : f32
    %489 = arith.divf %487, %488 : f32
    %490 = arith.subf %421, %417 : vector<1x256xf32>
    %491 = arith.subf %423, %419 : vector<1x256xf32>
    %cst_165 = arith.constant 5.000000e-01 : f32
    %492 = vector.broadcast %cst_165 : f32 to vector<1x256xf32>
    %493 = arith.mulf %492, %490 : vector<1x256xf32>
    %494 = arith.addf %417, %493 : vector<1x256xf32>
    %cst_166 = arith.constant 5.000000e-01 : f32
    %495 = vector.broadcast %cst_166 : f32 to vector<1x256xf32>
    %496 = arith.mulf %495, %491 : vector<1x256xf32>
    %497 = arith.addf %419, %496 : vector<1x256xf32>
    %cst_167 = arith.constant 1.000000e+00 : f32
    %498 = vector.broadcast %cst_167 : f32 to vector<1x256xf32>
    %499 = arith.maximumf %490, %498 : vector<1x256xf32>
    %cst_168 = arith.constant 1.000000e+00 : f32
    %500 = vector.broadcast %cst_168 : f32 to vector<1x256xf32>
    %501 = arith.maximumf %491, %500 : vector<1x256xf32>
    %502 = arith.subf %494, %25 : vector<1x256xf32>
    %503 = arith.divf %502, %23 : vector<1x256xf32>
    %504 = arith.subf %497, %26 : vector<1x256xf32>
    %505 = arith.divf %504, %24 : vector<1x256xf32>
    %506 = arith.divf %499, %23 : vector<1x256xf32>
    %507 = math.log %506 : vector<1x256xf32>
    %508 = arith.divf %501, %24 : vector<1x256xf32>
    %509 = math.log %508 : vector<1x256xf32>
    %510 = arith.subf %505, %15 : vector<1x256xf32>
    %511 = math.absf %510 : vector<1x256xf32>
    %cst_169 = arith.constant 0.111111112 : f32
    %512 = vector.broadcast %cst_169 : f32 to vector<1x256xf32>
    %513 = arith.cmpf ole, %511, %512 : vector<1x256xf32>
    %cst_170 = arith.constant 4.500000e+00 : f32
    %514 = vector.broadcast %cst_170 : f32 to vector<1x256xf32>
    %515 = arith.mulf %514, %511 : vector<1x256xf32>
    %516 = arith.mulf %515, %511 : vector<1x256xf32>
    %cst_171 = arith.constant 0.055555556 : f32
    %517 = vector.broadcast %cst_171 : f32 to vector<1x256xf32>
    %518 = arith.subf %511, %517 : vector<1x256xf32>
    %519 = arith.select %513, %516, %518 : vector<1x256xi1>, vector<1x256xf32>
    %520 = arith.subf %503, %16 : vector<1x256xf32>
    %521 = math.absf %520 : vector<1x256xf32>
    %cst_172 = arith.constant 0.111111112 : f32
    %522 = vector.broadcast %cst_172 : f32 to vector<1x256xf32>
    %523 = arith.cmpf ole, %521, %522 : vector<1x256xf32>
    %cst_173 = arith.constant 4.500000e+00 : f32
    %524 = vector.broadcast %cst_173 : f32 to vector<1x256xf32>
    %525 = arith.mulf %524, %521 : vector<1x256xf32>
    %526 = arith.mulf %525, %521 : vector<1x256xf32>
    %cst_174 = arith.constant 0.055555556 : f32
    %527 = vector.broadcast %cst_174 : f32 to vector<1x256xf32>
    %528 = arith.subf %521, %527 : vector<1x256xf32>
    %529 = arith.select %523, %526, %528 : vector<1x256xi1>, vector<1x256xf32>
    %530 = arith.addf %519, %529 : vector<1x256xf32>
    %531 = arith.subf %509, %17 : vector<1x256xf32>
    %532 = math.absf %531 : vector<1x256xf32>
    %cst_175 = arith.constant 0.111111112 : f32
    %533 = vector.broadcast %cst_175 : f32 to vector<1x256xf32>
    %534 = arith.cmpf ole, %532, %533 : vector<1x256xf32>
    %cst_176 = arith.constant 4.500000e+00 : f32
    %535 = vector.broadcast %cst_176 : f32 to vector<1x256xf32>
    %536 = arith.mulf %535, %532 : vector<1x256xf32>
    %537 = arith.mulf %536, %532 : vector<1x256xf32>
    %cst_177 = arith.constant 0.055555556 : f32
    %538 = vector.broadcast %cst_177 : f32 to vector<1x256xf32>
    %539 = arith.subf %532, %538 : vector<1x256xf32>
    %540 = arith.select %534, %537, %539 : vector<1x256xi1>, vector<1x256xf32>
    %541 = arith.addf %530, %540 : vector<1x256xf32>
    %542 = arith.subf %507, %18 : vector<1x256xf32>
    %543 = math.absf %542 : vector<1x256xf32>
    %cst_178 = arith.constant 0.111111112 : f32
    %544 = vector.broadcast %cst_178 : f32 to vector<1x256xf32>
    %545 = arith.cmpf ole, %543, %544 : vector<1x256xf32>
    %cst_179 = arith.constant 4.500000e+00 : f32
    %546 = vector.broadcast %cst_179 : f32 to vector<1x256xf32>
    %547 = arith.mulf %546, %543 : vector<1x256xf32>
    %548 = arith.mulf %547, %543 : vector<1x256xf32>
    %cst_180 = arith.constant 0.055555556 : f32
    %549 = vector.broadcast %cst_180 : f32 to vector<1x256xf32>
    %550 = arith.subf %543, %549 : vector<1x256xf32>
    %551 = arith.select %545, %548, %550 : vector<1x256xi1>, vector<1x256xf32>
    %552 = arith.addf %541, %551 : vector<1x256xf32>
    %cst_181 = arith.constant 0.000000e+00 : f32
    %553 = vector.broadcast %cst_181 : f32 to vector<1x256xf32>
    %554 = arith.select %427, %552, %553 : vector<1x256xi1>, vector<1x256xf32>
    %555 = vector.shape_cast %554 : vector<1x256xf32> to vector<1x1x256xf32>
    %cst_182 = arith.constant dense<0.000000e+00> : vector<1xf32>
    %556 = vector.multi_reduction <add>, %555, %cst_182 [1, 2] : vector<1x1x256xf32> to vector<1xf32>
    %557 = vector.shape_cast %556 : vector<1xf32> to vector<1x1x1xf32>
    %558 = vector.extract %557[0, 0, 0] : f32 from vector<1x1x1xf32>
    %cst_183 = arith.constant 0.000000e+00 : f32
    %559 = arith.cmpf ogt, %435, %cst_183 : f32
    %cst_184 = arith.constant 4.000000e+00 : f32
    %560 = arith.mulf %435, %cst_184 : f32
    %cst_185 = arith.constant 1.000000e+00 : f32
    %561 = arith.maximumf %560, %cst_185 : f32
    %562 = arith.divf %558, %561 : f32
    %cst_186 = arith.constant 0.000000e+00 : f32
    %563 = arith.select %559, %562, %cst_186 : f32
    %564 = tpu.iota {dimensions = array<i32: 2>} : vector<1x1x128xi32>
    %c0_i32 = arith.constant 0 : i32
    %565 = vector.broadcast %c0_i32 : i32 to vector<1x1x128xi32>
    %566 = arith.cmpi eq, %564, %565 : vector<1x1x128xi32>
    %c1_i32 = arith.constant 1 : i32
    %567 = vector.broadcast %c1_i32 : i32 to vector<1x1x128xi32>
    %568 = arith.cmpi eq, %564, %567 : vector<1x1x128xi32>
    %cst_187 = arith.constant 0.000000e+00 : f32
    %569 = vector.broadcast %563 : f32 to vector<1x1x128xf32>
    %570 = vector.broadcast %cst_187 : f32 to vector<1x1x128xf32>
    %571 = arith.select %568, %569, %570 : vector<1x1x128xi1>, vector<1x1x128xf32>
    %572 = vector.broadcast %489 : f32 to vector<1x1x128xf32>
    %573 = arith.select %566, %572, %571 : vector<1x1x128xi1>, vector<1x1x128xf32>
    %c0_188 = arith.constant 0 : index
    %c0_189 = arith.constant 0 : index
    %c0_190 = arith.constant 0 : index
    %574 = vector.load %arg8[%c0_188, %c0_189, %c0_190] : memref<1x1x128xf32, #tpu.memory_space<vmem>>, vector<1x1x128xf32>
    tpu.vector_store %arg8[%c0_188, %c0_189, %c0_190], %573 {strides = array<i32>} : memref<1x1x128xf32, #tpu.memory_space<vmem>>, vector<1x1x128xf32>,
    return
  }
  func.func @transform_0(%arg0: i32) -> (i32, i32, i32) {
    %c0_i32 = arith.constant 0 : i32
    %c0_i32_0 = arith.constant 0 : i32
    %c0_i32_1 = arith.constant 0 : i32
    return %arg0, %c0_i32, %c0_i32_0 : i32, i32, i32
  }
  func.func @transform_1(%arg0: i32) -> (i32, i32) {
    %c0_i32 = arith.constant 0 : i32
    %c0_i32_0 = arith.constant 0 : i32
    %c0_i32_1 = arith.constant 0 : i32
    return %c0_i32, %c0_i32_0 : i32, i32
  }
  func.func @transform_2(%arg0: i32) -> (i32, i32) {
    %c0_i32 = arith.constant 0 : i32
    %c0_i32_0 = arith.constant 0 : i32
    %c0_i32_1 = arith.constant 0 : i32
    return %c0_i32, %c0_i32_0 : i32, i32
  }
  func.func @transform_3(%arg0: i32) -> (i32, i32) {
    %c0_i32 = arith.constant 0 : i32
    %c0_i32_0 = arith.constant 0 : i32
    %c0_i32_1 = arith.constant 0 : i32
    return %c0_i32, %c0_i32_0 : i32, i32
  }
  func.func @transform_4(%arg0: i32) -> (i32, i32) {
    %c0_i32 = arith.constant 0 : i32
    %c0_i32_0 = arith.constant 0 : i32
    %c0_i32_1 = arith.constant 0 : i32
    return %c0_i32, %c0_i32_0 : i32, i32
  }
  func.func @transform_5(%arg0: i32) -> (i32, i32) {
    %c0_i32 = arith.constant 0 : i32
    %c0_i32_0 = arith.constant 0 : i32
    %c0_i32_1 = arith.constant 0 : i32
    return %c0_i32, %c0_i32_0 : i32, i32
  }
  func.func @transform_6(%arg0: i32) -> (i32, i32, i32) {
    %c0_i32 = arith.constant 0 : i32
    %c0_i32_0 = arith.constant 0 : i32
    %c0_i32_1 = arith.constant 0 : i32
    %c0_i32_2 = arith.constant 0 : i32
    return %c0_i32, %c0_i32_0, %c0_i32_1 : i32, i32, i32
  }
  func.func @transform_7(%arg0: i32) -> (i32, i32, i32) {
    %c0_i32 = arith.constant 0 : i32
    %c0_i32_0 = arith.constant 0 : i32
    %c0_i32_1 = arith.constant 0 : i32
    return %arg0, %c0_i32, %c0_i32_0 : i32, i32, i32
  }
}

</mosaic_0001>

<bundles_post_ra>
// kernel: model_with_loss.1
= control target key start
LH: loop header
LB: loop body
LE: loop exit
PB: predicated region body
PF: predicated region fallthrough
CT: control target
= control target key end

     0   :  { %s2451_s0 = inlined_call_operand.vmem [shape: f32[2,8,256], index: 0, kind: input, shape index: {}]   ;;  %s2452_s1 = inlined_call_operand.vmem [shape: f32[32,8], index: 1, kind: input, shape index: {}]   ;;  %s2453_s2 = inlined_call_operand.vmem [shape: f32[32,1], index: 2, kind: input, shape index: {}]   ;;  %s2454_s3 = inlined_call_operand.vmem [shape: f32[16,32], index: 3, kind: input, shape index: {}]   ;;  %s2455_s4 = inlined_call_operand.vmem [shape: f32[16,1], index: 4, kind: input, shape index: {}]   ;;  %s2456_s5 = inlined_call_operand.vmem [shape: f32[8,256], index: 5, kind: input, shape index: {}]   ;;  %s2457_s6 = inlined_call_operand.vmem [shape: f32[2,8,5], index: 6, kind: input, shape index: {}]   ;;  %s2458_s7 = inlined_call_operand.vmem [shape: f32[2,1,128], index: 7, kind: output, shape index: {}]  }
   0x1   :  { %2470 = sst [smem:[#allocation14_spill]] %s2451_s0 }
   0x2   :  { %2471 = sst [smem:[#allocation15_spill]] %s2452_s1 }
   0x3   :  { %2472 = sst [smem:[#allocation16_spill]] %s2453_s2 }
   0x4   :  { %2473 = sst [smem:[#allocation17_spill]] %s2454_s3 }
   0x5   :  { %2474 = sst [smem:[#allocation18_spill]] %s2456_s5 }
   0x6   :  { %2475 = sst [smem:[#allocation19_spill]] %s2457_s6 }
   0x7   :  { %2476 = sst [smem:[#allocation20_spill]] %s2458_s7 }
   0x8   :  { %12 = vsyncpa [#allocation3], 0  ;;  %s1512_s24 = smov 0  }
   0x9 LB: > { %2477 = sst [smem:[#allocation5_spill]] %s1462_s24  ;;  %s1287_s25 = sadd.s32 4294967295, %s1462_s24   ;;  %s1462_s24 = sphi %s1512_s24, %s18_s24  }
   0xa   : > { %p1289_p0 = scmp.ge.s32.totalorder %s1462_s24, 1  ;;  %p201_p1 = scmp.lt.s32.totalorder %s1462_s24, 3 }
   0xb   : > { %s2478_s6 = sld [smem:[#allocation19_spill]]  ;;  %p1374_p3 = scmp.eq.s32.totalorder %s1287_s25, 0 }
   0xc   : > { %p202_p2 = pnand %p1289_p0, %p201_p1  ;;  %s1464_s29 = smov [#allocation2]  }
   0xd   : > { %s1465_s30 = smov 128   ;;  %s1466_s8 = smov 8  }
   0xe   : > { %p1370_p4 = pneg %p202_p2  ;;  %251 = sbr.rel (%p202_p2) target bundleno = 565 (0x235), region = 48 }
  0x10   : > { %p1371_p5 = pnand %p1374_p3, %p1370_p4 }
  0x11   : > { %s227_s28 = sshll.u32 %s2478_s6, 4  ;;  %s228_s28 = int_to_ptr.vmem [resolvable:$true] %s227_s28 }
  0x12   : > { %1373 = dma.vmem_to_smem (!%p1371_p5), %s228_s28, 256, %s1464_s29, [#allocation3], %s1465_s30, %s1465_s30, %s1466_s8  }
  0x13   : > { %1457 = dma.done.wait (%p1374_p3), [#allocation3], 256  }
  0x14   : > { %1459 = vsyncadd (%p1374_p3), [#allocation3], 4294967040 }
  0x15   : > { %258 = sfence }
  0x16   : > { %p283_p6 = scmp.lt.s32.totalorder %s1287_s25, 1  ;;  %s2479_s2 = sld [smem:[#allocation16_spill]]  ;;  %v1467_v1 = vmov 0   ;;  %vm321_vm0 = vcmask 64512  }
  0x17   : > { %s1526_s11 = sshll.u32 %s1287_s25, 10  ;;  %1393 = vset.pattern.permute.xlu1 %v1467_v1  ;;  %1392 = vset.pattern.permute.xlu0 %v1467_v1  ;;  %s2481_s0 = sld [smem:[#allocation14_spill]] }
  0x18   : > { %s2552_s25 = smov (!%p283_p6, %s1287_s25), 1  ;;  %1394 = vset.pattern.permute.xlu2 %v1467_v1  ;;  %s2482_s1 = sld [smem:[#allocation15_spill]] }
  0x19   : > { %2480 = sst [smem:[#allocation6_spill]] %s2552_s25  ;;  %s1333_s12 = sshll.u32 %s2552_s25, 4 }
  0x1a   : > { %s1544_s20 = sld [smem:[#allocation2 + %s1526_s11]]  ;;  %s486_s21 = sadd.s32 1, %s1526_s11 }
  0x1b   : > { %s488_s22 = sadd.s32 2, %s1526_s11  ;;  %s1548_s23 = sld [smem:[#allocation2 + %s486_s21]] }
  0x1c   : > { %v298_v0 = vld [vmem:[%s2479_s2 + $0x8] sm:$0xff]  ;;  %v300_v2 = vld [vmem:[%s2479_s2 + $0x18] sm:$0xff]  ;;  %s490_s26 = sadd.s32 3, %s1526_s11  ;;  %v297_v6 = vld [vmem:[%s2479_s2] sm:$0xff]  ;;  %s1556_s29 = sld [smem:[#allocation2 + %s488_s22]] }
  0x1d   : > { %308 = vperm.xlu1 %1393, %v298_v0   ;;  %s287_s17 = scalar_lea.vmem %s2481_s0, %s1333_s12  ;;  %318 = vperm.xlu0 %1392, %v300_v2   ;;  %s492_s30 = sadd.s32 4, %s1526_s11  ;;  %v299_v9 = vld [vmem:[%s2479_s2 + $0x10] sm:$0xff] }
  0x1e   : > { %v293_v3 = vld [vmem:[%s2482_s1] sm:$0xff]  ;;  %v292_v5 = vld [vmem:[%s287_s17 + $0x8] sm:$0xff]  ;;  %s2483_s5 = sld [smem:[#allocation18_spill]]  ;;  %s1567_s12 = sadd.s32 128, %s1526_s11  ;;  %v295_v36 = vld [vmem:[%s2482_s1 + $0x10] sm:$0xff] }
  0x1f   : > { %v291_v4 = vld [vmem:[%s287_s17] sm:$0xff]  ;;  %378 = vmatpush.msra.mxu1 %v292_v5  ;;  %s1564_s10 = sld [smem:[#allocation2 + %s490_s26]]  ;;  %s545_s16 = sadd.s32 1, %s1567_s12  ;;  %v294_v17 = vld [vmem:[%s2482_s1 + $0x8] sm:$0xff]  ;;  %v296_v53 = vld [vmem:[%s2482_s1 + $0x18] sm:$0xff] }
  0x20   : > { %349 = vmatpush.msra.mxu0 %v291_v4  ;;  %1300 = vmatmul.msk.f32.vlgmr.msra.gmra.mxu1 %vm321_vm0, %v293_v3  ;;  %s1574_s15 = sld [smem:[#allocation2 + %s492_s30]]  ;;  %v500_v12 = vstv %s1544_s20  ;;  %s547_s28 = sadd.s32 2, %s1567_s12 }
  0x21   : > { %1296 = vmatmul.msk.f32.vlgmr.msra.gmra.mxu0 %vm321_vm0, %v293_v3  ;;  %s1592_s27 = sld [smem:[#allocation2 + %s1567_s12]]  ;;  %v506_v16 = vstv %s1548_s23  ;;  %s549_s18 = sadd.s32 3, %s1567_s12 }
  0x22   : > { %s1598_s9 = sld [smem:[#allocation2 + %s545_s16]]  ;;  %v498_v18 = vstv %s1556_s29  ;;  %s551_s16 = sadd.s32 4, %s1567_s12 }
  0x23   : > { %s1607_s17 = sld [smem:[#allocation2 + %s547_s28]]  ;;  %s1627_s28 = sadd.s32 256, %s1526_s11 }
  0x24   : > { %v1562_v7 = vld [vmem:[%s2483_s5] ss:$8 sm:$0x3]  ;;  %v1572_v8 = vld [vmem:[%s2483_s5 + $0x1] ss:$8 sm:$0x3]  ;;  %s495_s22 = ssub.f32 %s1556_s29, %s1544_s20 }
  0x25   : > { %303 = vperm.xlu1 %1393, %v297_v6   ;;  %v1583_v10 = vld [vmem:[%s2483_s5 + $0x2] ss:$8 sm:$0x3]  ;;  %v1588_v11 = vld [vmem:[%s2483_s5 + $0x3] ss:$8 sm:$0x3]  ;;  %v501_v15 = vmax.f32 %v1572_v8, %v500_v12  ;;  %313 = vperm.xlu0 %1392, %v299_v9   ;;  %v507_v19 = vmax.f32 %v1562_v7, %v506_v16  ;;  %s496_s26 = ssub.f32 %s1564_s10, %s1548_s23  ;;  %v504_v21 = vstv %s1564_s10 }
  0x26   : > { %v1311_v13 = vld [vmem:[%s2483_s5 + $0x4] ss:$8 sm:$0x3]  ;;  %v1312_v14 = vld [vmem:[%s2483_s5 + $0x5] ss:$8 sm:$0x3]  ;;  %v499_v20 = vmin.f32 %v1588_v11, %v498_v18  ;;  %v505_v23 = vmin.f32 %v1583_v10, %v504_v21 }
  0x27   : > { %v1629_v22 = vmul.f32 %v1312_v14, %v1311_v13  ;;  %s1634_s30 = sld [smem:[#allocation2 + %s549_s18]]  ;;  %s497_s12 = smul.f32 %s496_s26, %s495_s22  ;;  %v559_v26 = vstv %s1592_s27 }
  0x28   : > { %1301 = vmatmul.msk.f32.gmra.mxu1 %vm321_vm0, %v294_v17  ;;  %v502_v24 = vsub.f32 %v499_v20, %v501_v15  ;;  %v508_v25 = vsub.f32 %v505_v23, %v507_v19  ;;  %s1638_s8 = sld [smem:[#allocation2 + %s551_s16]]  ;;  %v565_v27 = vstv %s1598_s9  ;;  %s604_s13 = sadd.s32 1, %s1627_s28  ;;  %v560_v31 = vmax.f32 %v1572_v8, %v559_v26 }
  0x29   : > { %1297 = vmatmul.msk.f32.gmra.mxu0 %vm321_vm0, %v294_v17  ;;  %p494_p7 = scmp.ne.f32.partialorder %s1574_s15, -1.0  ;;  %v511_v29 = vstv %s497_s12  ;;  %s554_s14 = ssub.f32 %s1607_s17, %s1592_s27  ;;  %v557_v30 = vstv %s1607_s17  ;;  %v566_v35 = vmax.f32 %v1562_v7, %v565_v27 }
  0x2a   : > { %v503_v28 = vmax.f32 %v502_v24, 0.0  ;;  %v509_v32 = vmax.f32 %v508_v25, 0.0  ;;  %v512_v33 = vadd.f32 %v511_v29, %v1629_v22  ;;  %v558_v34 = vmin.f32 %v1588_v11, %v557_v30  ;;  %s1655_s18 = sld [smem:[#allocation2 + %s1627_s28]]  ;;  %s606_s19 = sadd.s32 2, %s1627_s28 }
  0x2b   : > { %s1661_s21 = sld [smem:[#allocation2 + %s604_s13]]  ;;  %s608_s22 = sadd.s32 3, %s1627_s28 }
  0x2c   : > { %v1667_v37 = vmul.f32 %v509_v32, %v503_v28  ;;  %v561_v38 = vsub.f32 %v558_v34, %v560_v31  ;;  %s610_s0 = sadd.s32 4, %s1627_s28  ;;  %s1676_s2 = sld [smem:[#allocation2 + %s606_s19]] }
  0x2d   : > { %s555_s12 = ssub.f32 %s1634_s30, %s1598_s9  ;;  %v563_v39 = vstv %s1634_s30  ;;  %s1679_s13 = sadd.s32 384, %s1526_s11 }
  0x2e   : > { %v564_v40 = vmin.f32 %v1583_v10, %v563_v39  ;;  %v513_v41 = vsub.f32 %v512_v33, %v1667_v37  ;;  %s1682_s26 = sld [smem:[#allocation2 + %s608_s22]]  ;;  %v562_v42 = vmax.f32 %v561_v38, 0.0  ;;  %s663_s19 = sadd.s32 1, %s1679_s13 }
  0x2f   : > { %s556_s16 = smul.f32 %s555_s12, %s554_s14  ;;  %s1692_s14 = sld [smem:[#allocation2 + %s610_s0]] }
  0x30   : > { %1302 = vmatmul.msk.f32.gmra.mxu1 %vm321_vm0, %v295_v36  ;;  %s1688_s28 = scalar_select %p494_p7, 1, 0  ;;  %v567_v43 = vsub.f32 %v564_v40, %v566_v35  ;;  %v1690_v44 = vmax.f32 %v513_v41, 1e-08  ;;  %v618_v46 = vstv %s1655_s18 }
  0x31   : > { %2484 = sst [smem:[#allocation7_spill]] %s1661_s21  ;;  %1298 = vmatmul.msk.f32.gmra.mxu0 %vm321_vm0, %v295_v36  ;;  %v570_v45 = vstv %s556_s16  ;;  %v619_v49 = vmax.f32 %v1572_v8, %v618_v46  ;;  %s665_s12 = sadd.s32 2, %s1679_s13  ;;  %v624_v52 = vstv %s1661_s21 }
  0x32   : > { %v568_v47 = vmax.f32 %v567_v43, 0.0  ;;  %v571_v48 = vadd.f32 %v570_v45, %v1629_v22  ;;  %s1698_s22 = sld [smem:[#allocation2 + %s1679_s13]]  ;;  %1395 = vrcp.f32 %v1690_v44  ;;  %v616_v51 = vstv %s1676_s2  ;;  %s667_s25 = sadd.s32 3, %s1679_s13 }
  0x33   : > { %s1704_s0 = sld [smem:[#allocation2 + %s663_s19]]  ;;  %v617_v54 = vmin.f32 %v1588_v11, %v616_v51  ;;  %v625_v58 = vmax.f32 %v1562_v7, %v624_v52  ;;  %p553_p8 = scmp.ne.f32.partialorder %s1638_s8, -1.0  ;;  %v531_v63 = vstv %s1688_s28  ;;  %vm520_vm1 = vweird.f32 %v1690_v44 }
  0x34   : > { %2485 = sst [smem:[#allocation8_spill]] %s1682_s26  ;;  %v1707_v50 = vmul.f32 %v568_v47, %v562_v42  ;;  %v622_v55 = vstv %s1682_s26  ;;  %v524_v6 = vand.u32 2147483647, %v1690_v44  ;;  %v526_v9 = vand.u32 2147483648, %v1690_v44  ;;  %s1902_s29 = sadd.s32 768, %s1526_s11 }
  0x35   : > { %s613_s16 = ssub.f32 %s1676_s2, %s1655_s18  ;;  %v623_v57 = vmin.f32 %v1583_v10, %v622_v55  ;;  %v620_v59 = vsub.f32 %v617_v54, %v619_v49  ;;  %vm1771_vm3 = vcmp.eq.s32.totalorder %v531_v63, 1  ;;  %p612_p9 = scmp.ne.f32.partialorder %s1692_s14, -1.0 }
  0x36   : > { %s614_s7 = ssub.f32 %s1682_s26, %s1661_s21  ;;  %v572_v56 = vsub.f32 %v571_v48, %v1707_v50  ;;  %v527_v32 = vor.u32 1.1754944e-38, %v526_v9  ;;  %vm1797_vm5 = vcmp.eq.f32.partialorder %v524_v6, 8.507059e+37  ;;  %s842_s17 = sadd.s32 2, %s1902_s29 }
  0x37   : > { %s1730_s19 = sld [smem:[#allocation2 + %s665_s12]]  ;;  %v626_v61 = vsub.f32 %v623_v57, %v625_v58  ;;  %v621_v0 = vmax.f32 %v620_v59, 0.0  ;;  %v540_v59 = vstv %s1574_s15  ;;  %s844_s27 = sadd.s32 3, %s1902_s29 }
  0x38   : > { %s615_s6 = smul.f32 %s614_s7, %s613_s16  ;;  %1303 = vmatmul.msk.f32.gmra.mxu1 %vm321_vm0, %v296_v53  ;;  %v1735_v60 = vmax.f32 %v572_v56, 1e-08  ;;  %s1737_s24 = sld [smem:[#allocation2 + %s667_s25]]  ;;  %v1396_v62 = vpop.eup %1395  ;;  %v677_v3 = vstv %s1698_s22 }
  0x39   : > { %2486 = sst [smem:[#allocation9_spill]] %s1704_s0  ;;  %1299 = vmatmul.msk.f32.gmra.mxu0 %vm321_vm0, %v296_v53  ;;  %s1742_s7 = sadd.s32 512, %s1526_s11  ;;  %v516_v4 = vmul.f32 %v1396_v62, %v1690_v44  ;;  %v683_v5 = vstv %s1704_s0  ;;  %v627_v13 = vmax.f32 %v626_v61, 0.0  ;;  %vm521_vm2 = vweird.f32 %v1396_v62 }
  0x3a   : > { %v629_v2 = vstv %s615_s6  ;;  %1397 = vrcp.f32 %v1735_v60  ;;  %s669_s25 = sadd.s32 4, %s1679_s13  ;;  %v678_v19 = vmax.f32 %v1572_v8, %v677_v3  ;;  %s724_s12 = sadd.s32 2, %s1742_s7  ;;  %v684_v23 = vmax.f32 %v1562_v7, %v683_v5  ;;  %vm1785_vm4 = vmor %vm520_vm1, %vm521_vm2 }
  0x3b   : > { %s1753_s28 = scalar_select %p553_p8, 1, 0  ;;  %v630_v14 = vadd.f32 %v629_v2, %v1629_v22  ;;  %v517_v15 = vsub.f32 1.0, %v516_v4  ;;  %v1763_v20 = vmul.f32 %v627_v13, %v621_v0  ;;  %vm579_vm6 = vweird.f32 %v1735_v60 }
  0x3c   : > { %s1765_s16 = sld [smem:[#allocation2 + %s669_s25]]  ;;  %s722_s6 = sadd.s32 1, %s1742_s7  ;;  %v583_v43 = vand.u32 2147483647, %v1735_v60  ;;  %v585_v48 = vand.u32 2147483648, %v1735_v60 }
  0x3d   : > { %s672_s13 = ssub.f32 %s1730_s19, %s1698_s22  ;;  %v675_v17 = vstv %s1730_s19  ;;  %v518_v24 = vmul.f32 %v1396_v62, %v517_v15  ;;  %v590_v33 = vstv %s1753_s28  ;;  %v631_v34 = vsub.f32 %v630_v14, %v1763_v20  ;;  %s726_s5 = sadd.s32 3, %s1742_s7 }
  0x3e   : > { %2487 = sst [smem:[#allocation10_spill]] %s1737_s24  ;;  %v676_v28 = vmin.f32 %v1588_v11, %v675_v17  ;;  %v681_v29 = vstv %s1737_s24  ;;  %v586_v2 = vor.u32 1.1754944e-38, %v585_v48  ;;  %vm1845_vm9 = vcmp.eq.s32.totalorder %v590_v33, 1 }
  0x3f   : > { %s673_s1 = ssub.f32 %s1737_s24, %s1704_s0  ;;  %v682_v35 = vmin.f32 %v1583_v10, %v681_v29  ;;  %v519_v38 = vadd.f32 %v1396_v62, %v518_v24  ;;  %v1807_v44 = vmax.f32 %v631_v34, 1e-08  ;;  %s1812_s24 = sadd.s32 640, %s1526_s11  ;;  %vm584_vm11 = vcmp.eq.f32.partialorder %v583_v43, 8.507059e+37 }
  0x40   : > { %s1794_s25 = sld [smem:[#allocation2 + %s724_s12]]  ;;  %v1398_v36 = vpop.eup %1397  ;;  %v679_v41 = vsub.f32 %v676_v28, %v678_v19  ;;  %v658_v15 = vstv %s1692_s14 }
  0x41   : > { %s674_s0 = smul.f32 %s673_s1, %s672_s13  ;;  %s1803_s28 = sld [smem:[#allocation2 + %s1742_s7]]  ;;  %v575_v42 = vmul.f32 %v1398_v36, %v1735_v60  ;;  %v685_v45 = vsub.f32 %v682_v35, %v684_v23  ;;  %v523_v47 = vsel %vm1785_vm4, %v1396_v62, %v519_v38  ;;  %vm580_vm7 = vweird.f32 %v1398_v36 }
  0x42   : > { %s1809_s12 = sld [smem:[#allocation2 + %s722_s6]]  ;;  %v680_v49 = vmax.f32 %v679_v41, 0.0  ;;  %v528_v54 = vsel %vm1797_vm5, %v527_v32, %v523_v47  ;;  %1399 = vrcp.f32 %v1807_v44  ;;  %s781_s6 = sadd.s32 1, %s1812_s24  ;;  %v599_v62 = vstv %s1638_s8  ;;  %vm1841_vm8 = vmor %vm579_vm6, %vm580_vm7 }
  0x43   : > { %v688_v53 = vstv %s674_s0  ;;  %s1817_s1 = sld [smem:[#allocation2 + %s726_s5]]  ;;  %v576_v56 = vsub.f32 1.0, %v575_v42  ;;  %v529_v57 = vmul.f32 %v528_v54, %v1667_v37  ;;  %v686_v58 = vmax.f32 %v685_v45, 0.0  ;;  %s783_s0 = sadd.s32 2, %s1812_s24 }
  0x44   : > { %s1824_s13 = scalar_select %p612_p9, 1, 0  ;;  %v689_v63 = vadd.f32 %v688_v53, %v1629_v22  ;;  %vm638_vm12 = vweird.f32 %v1807_v44  ;;  %v642_v13 = vand.u32 2147483647, %v1807_v44  ;;  %v644_v14 = vand.u32 2147483648, %v1807_v44 }
  0x45   : > { %v577_v61 = vmul.f32 %v1398_v36, %v576_v56  ;;  %s1832_s5 = sld [smem:[#allocation2 + %s1812_s24]]  ;;  %v1837_v0 = vsel %vm1771_vm3, %v529_v57, -1.0  ;;  %v1849_v6 = vmul.f32 %v686_v58, %v680_v49  ;;  %s785_s8 = sadd.s32 3, %s1812_s24 }
  0x46   : > { %vm534_vm10 = vcmp.gt.f32.partialorder %v1837_v0, -1.0  ;;  %p671_p10 = scmp.ne.f32.partialorder %s1765_s16, -1.0  ;;  %v734_v9 = vstv %s1794_s25  ;;  %s1857_s3 = sld [smem:[#allocation2 + %s781_s6]]  ;;  %v645_v42 = vor.u32 1.1754944e-38, %v644_v14  ;;  %v649_v43 = vstv %s1824_s13 }
  0x47   : > { %v578_v60 = vadd.f32 %v1398_v36, %v577_v61  ;;  %v535_v23 = vsel %vm534_vm10, %v1837_v0, -1.0  ;;  %v536_v24 = vsel %vm534_vm10, %v500_v12, 0.0  ;;  %v690_v28 = vsub.f32 %v689_v63, %v1849_v6  ;;  %s1875_s6 = sld [smem:[#allocation2 + %s783_s0]] }
  0x48   : > { %2494 = sst [smem:[#allocation11_spill]] %s1809_s12  ;;  %v1400_v19 = vpop.eup %1399  ;;  %v735_v33 = vmin.f32 %v1588_v11, %v734_v9  ;;  %v736_v34 = vstv %s1803_s28  ;;  %v538_v12 = vsel %vm534_vm10, %v498_v18, 0.0  ;;  %v541_v40 = vsel %vm534_vm10, %v540_v59, -1.0 }
  0x49   : > { %2495 = sst [smem:[#allocation12_spill]] %s1817_s1  ;;  %v582_v25 = vsel %vm1841_vm8, %v1398_v36, %v578_v60  ;;  %v634_v32 = vmul.f32 %v1400_v19, %v1807_v44  ;;  %v1889_v36 = vmax.f32 %v690_v28, 1e-08  ;;  %v737_v38 = vmax.f32 %v1572_v8, %v736_v34 }
  0x4a   : > { %s732_s15 = ssub.f32 %s1817_s1, %s1809_s12  ;;  %v587_v31 = vsel %vm584_vm11, %v586_v2, %v582_v25  ;;  %vm639_vm13 = vweird.f32 %v1400_v19  ;;  %v740_v18 = vstv %s1817_s1  ;;  %v742_v49 = vstv %s1809_s12  ;;  %s728_s1 = sadd.s32 4, %s1742_s7 }
  0x4b   : > { %s1882_s20 = sld [smem:[#allocation2 + %s785_s8]]  ;;  %v588_v35 = vmul.f32 %v587_v31, %v1707_v50  ;;  %v635_v41 = vsub.f32 1.0, %v634_v32  ;;  %1401 = vrcp.f32 %v1889_v36  ;;  %v738_v48 = vsub.f32 %v735_v33, %v737_v38  ;;  %vm1931_vm15 = vmor %vm638_vm12, %vm639_vm13 }
  0x4c   : > { %s1893_s0 = scalar_select %p671_p10, 1, 0  ;;  %vm1941_vm0 = vcmp.eq.f32.partialorder %v642_v13, 8.507059e+37  ;;  %vm1945_vm1 = vcmp.eq.s32.totalorder %v649_v43, 1  ;;  %vm697_vm2 = vweird.f32 %v1889_v36  ;;  %v701_v61 = vand.u32 2147483647, %v1889_v36 }
  0x4d   : > { %v592_v50 = vsel %vm1845_vm9, %v588_v35, -1.0  ;;  %s2501_s8 = ssub.f32 %s1794_s25, %s1803_s28  ;;  %v636_v47 = vmul.f32 %v1400_v19, %v635_v41  ;;  %v703_v2 = vand.u32 2147483648, %v1889_v36  ;;  %v739_v4 = vmax.f32 %v738_v48, 0.0 }
  0x4e   : > { %vm1913_vm14 = vcmp.gt.f32.partialorder %v592_v50, %v535_v23  ;;  %v708_v44 = vstv %s1893_s0  ;;  %v793_v60 = vstv %s1875_s6  ;;  %s1968_s21 = sld [smem:[#allocation2 + %s842_s17]]  ;;  %v795_v28 = vstv %s1832_s5 }
  0x4f   : > { %s1911_s26 = smul.f32 %s732_s15, %s2501_s8  ;;  %v595_v53 = vsel %vm1913_vm14, %v559_v26, %v536_v24  ;;  %v597_v54 = vsel %vm1913_vm14, %v557_v30, %v538_v12  ;;  %v600_v56 = vsel %vm1913_vm14, %v599_v62, %v541_v40  ;;  %v741_v26 = vmin.f32 %v1583_v10, %v740_v18  ;;  %s840_s15 = sadd.s32 1, %s1902_s29 }
  0x50   : > { %v637_v58 = vadd.f32 %v1400_v19, %v636_v47  ;;  %v743_v62 = vmax.f32 %v1562_v7, %v742_v49  ;;  %s1960_s8 = sld [smem:[#allocation2 + %s1902_s29]]  ;;  %v794_v25 = vmin.f32 %v1588_v11, %v793_v60  ;;  %v796_v33 = vmax.f32 %v1572_v8, %v795_v28 }
  0x51   : > { %2500 = sst [smem:[#allocation13_spill]] %s1882_s20  ;;  %v747_v63 = vstv %s1911_s26  ;;  %v1402_v13 = vpop.eup %1401  ;;  %v801_v35 = vstv %s1857_s3  ;;  %vm2027_vm5 = vcmp.eq.f32.partialorder %v701_v61, 8.507059e+37  ;;  %vm709_vm7 = vcmp.eq.s32.totalorder %v708_v44, 1 }
  0x52   : > { %s791_s13 = ssub.f32 %s1882_s20, %s1857_s3  ;;  %v641_v37 = vsel %vm1931_vm15, %v1400_v19, %v637_v58  ;;  %v744_v24 = vsub.f32 %v741_v26, %v743_v62  ;;  %v594_v19 = vsel %vm1913_vm14, %v592_v50, %v535_v23  ;;  %v693_v32 = vmul.f32 %v1402_v13, %v1889_v36 }
  0x53   : > { %v646_v14 = vsel %vm1941_vm0, %v645_v42, %v641_v37  ;;  %s1976_s26 = sld [smem:[#allocation2 + %s840_s15]]  ;;  %v799_v23 = vstv %s1882_s20  ;;  %v797_v41 = vsub.f32 %v794_v25, %v796_v33  ;;  %vm698_vm4 = vweird.f32 %v1402_v13 }
  0x54   : > { %v647_v31 = vmul.f32 %v646_v14, %v1763_v20  ;;  %s2510_s7 = ssub.f32 %s1875_s6, %s1832_s5  ;;  %v745_v12 = vmax.f32 %v744_v24, 0.0  ;;  %v748_v20 = vadd.f32 %v747_v63, %v1629_v22  ;;  %v694_v40 = vsub.f32 1.0, %v693_v32  ;;  %vm2037_vm6 = vmor %vm697_vm2, %vm698_vm4 }
  0x55   : > { %s1990_s12 = sld [smem:[#allocation2 + %s844_s27]]  ;;  %v800_v50 = vmin.f32 %v1583_v10, %v799_v23  ;;  %s2003_s27 = sadd.s32 896, %s1526_s11  ;;  %v802_v47 = vmax.f32 %v1562_v7, %v801_v35  ;;  %v717_v44 = vstv %s1765_s16 }
  0x56   : > { %s1985_s17 = smul.f32 %s791_s13, %s2510_s7  ;;  %s1992_s15 = sld [smem:[#allocation2 + %s728_s1]]  ;;  %v651_v38 = vsel %vm1945_vm1, %v647_v31, -1.0  ;;  %v2009_v43 = vmul.f32 %v745_v12, %v739_v4  ;;  %v695_v30 = vmul.f32 %v1402_v13, %v694_v40 }
  0x57   : > { %vm2005_vm3 = vcmp.gt.f32.partialorder %v651_v38, %v594_v19  ;;  %s849_s2 = ssub.f32 %s1968_s21, %s1960_s8  ;;  %s899_s11 = sadd.s32 1, %s2003_s27 }
  0x58   : > { %v654_v48 = vsel %vm2005_vm3, %v618_v46, %v595_v53  ;;  %v656_v57 = vsel %vm2005_vm3, %v616_v51, %v597_v54  ;;  %v659_v26 = vsel %vm2005_vm3, %v658_v15, %v600_v56  ;;  %v806_v58 = vstv %s1985_s17  ;;  %s901_s14 = sadd.s32 2, %s2003_s27  ;;  %s2050_s1 = sld [smem:[#allocation2 + %s2003_s27]] }
  0x59   : > { %v749_v62 = vsub.f32 %v748_v20, %v2009_v43  ;;  %v803_v46 = vsub.f32 %v800_v50, %v802_v47  ;;  %v704_v15 = vor.u32 1.1754944e-38, %v703_v2  ;;  %v798_v53 = vmax.f32 %v797_v41, 0.0  ;;  %s903_s13 = sadd.s32 3, %s2003_s27  ;;  %s787_s7 = sadd.s32 4, %s1812_s24 }
  0x5a   : > { %v852_v54 = vstv %s1968_s21  ;;  %v854_v56 = vstv %s1960_s8  ;;  %v696_v61 = vadd.f32 %v1402_v13, %v695_v30  ;;  %v807_v36 = vadd.f32 %v806_v58, %v1629_v22  ;;  %s2062_s17 = sld [smem:[#allocation2 + %s899_s11]]  ;;  %s846_s16 = sadd.s32 4, %s1902_s29 }
  0x5b   : > { %s850_s18 = ssub.f32 %s1990_s12, %s1976_s26  ;;  %v2046_v63 = vmax.f32 %v749_v62, 1e-08  ;;  %v804_v37 = vmax.f32 %v803_v46, 0.0  ;;  %v853_v2 = vmin.f32 %v1588_v11, %v852_v54  ;;  %v855_v4 = vmax.f32 %v1572_v8, %v854_v56 }
  0x5c   : > { %v858_v14 = vstv %s1990_s12  ;;  %v860_v24 = vstv %s1976_s26  ;;  %v700_v25 = vsel %vm2037_vm6, %v1402_v13, %v696_v61  ;;  %p730_p11 = scmp.ne.f32.partialorder %s1992_s15, -1.0  ;;  %s2068_s24 = sld [smem:[#allocation2 + %s901_s14]]  ;;  %v2072_v31 = vsel %vm2005_vm3, %v651_v38, %v594_v19 }
  0x5d   : > { %1403 = vrcp.f32 %v2046_v63  ;;  %v705_v32 = vsel %vm2027_vm5, %v704_v15, %v700_v25  ;;  %v2078_v33 = vmul.f32 %v804_v37, %v798_v53  ;;  %s851_s11 = smul.f32 %s850_s18, %s849_s2  ;;  %s2083_s20 = sld [smem:[#allocation2 + %s903_s13]]  ;;  %v856_v12 = vsub.f32 %v853_v2, %v855_v4 }
  0x5e   : > { %v706_v13 = vmul.f32 %v705_v32, %v1849_v6  ;;  %v859_v19 = vmin.f32 %v1583_v10, %v858_v14  ;;  %v861_v20 = vmax.f32 %v1562_v7, %v860_v24  ;;  %s2094_s0 = sld [smem:[#allocation2 + %s787_s7]]  ;;  %vm756_vm9 = vweird.f32 %v2046_v63 }
  0x5f   : > { %v808_v38 = vsub.f32 %v807_v36, %v2078_v33  ;;  %s2104_s2 = scalar_select %p730_p11, 1, 0  ;;  %v865_v47 = vstv %s851_s11  ;;  %v857_v46 = vmax.f32 %v856_v12, 0.0  ;;  %v913_v61 = vstv %s2050_s1 }
  0x60   : > { %v710_v40 = vsel %vm709_vm7, %v706_v13, -1.0  ;;  %v862_v41 = vsub.f32 %v859_v19, %v861_v20  ;;  %v914_v4 = vmax.f32 %v1572_v8, %v913_v61  ;;  %v919_v13 = vstv %s2062_s17  ;;  %s2169_s29 = sld [smem:[#allocation2 + %s846_s16]] }
  0x61   : > { %vm2097_vm8 = vcmp.gt.f32.partialorder %v710_v40, %v2072_v31  ;;  %v2106_v50 = vmax.f32 %v808_v38, 1e-08  ;;  %v767_v36 = vstv %s2104_s2  ;;  %v920_v20 = vmax.f32 %v1562_v7, %v919_v13  ;;  %s2535_s11 = sld [smem:[#allocation17_spill]] }
  0x62   : > { %v2112_v30 = vsel %vm2097_vm8, %v677_v3, %v654_v48  ;;  %v2118_v59 = vsel %vm2097_vm8, %v675_v17, %v656_v57  ;;  %v2122_v62 = vsel %vm2097_vm8, %v717_v44, %v659_v26  ;;  %s908_s22 = ssub.f32 %s2068_s24, %s2050_s1  ;;  %v760_v3 = vand.u32 2147483647, %v2046_v63 }
  0x63   : > { %v1404_v58 = vpop.eup %1403  ;;  %v762_v48 = vand.u32 2147483648, %v2046_v63  ;;  %1405 = vrcp.f32 %v2106_v50  ;;  %s909_s19 = ssub.f32 %s2083_s20, %s2062_s17  ;;  %v863_v17 = vmax.f32 %v862_v41, 0.0  ;;  %v866_v57 = vadd.f32 %v865_v47, %v1629_v22 }
  0x64   : > { %v752_v51 = vmul.f32 %v1404_v58, %v2046_v63  ;;  %vm757_vm11 = vweird.f32 %v1404_v58  ;;  %v911_v26 = vstv %s2068_s24  ;;  %v917_v37 = vstv %s2083_s20  ;;  %p789_p12 = scmp.ne.f32.partialorder %s2094_s0, -1.0  ;;  %s2541_s9 = sld [smem:[#allocation18_spill]] }
  0x65   : > { %v912_v53 = vmin.f32 %v1588_v11, %v911_v26  ;;  %v2141_v2 = vmul.f32 %v863_v17, %v857_v46  ;;  %s2146_s18 = smul.f32 %s909_s19, %s908_s22  ;;  %v918_v32 = vmin.f32 %v1583_v10, %v917_v37  ;;  %vm2155_vm12 = vmor %vm756_vm9, %vm757_vm11  ;;  %v763_v12 = vor.u32 1.1754944e-38, %v762_v48  ;;  %s2548_s21 = sld [smem:[#allocation6_spill]] }
  0x66   : > { %v753_v15 = vsub.f32 1.0, %v752_v51  ;;  %vm761_vm13 = vcmp.eq.f32.partialorder %v760_v3, 8.507059e+37  ;;  %vm2164_vm15 = vcmp.eq.s32.totalorder %v767_v36, 1  ;;  %vm815_vm0 = vweird.f32 %v2106_v50  ;;  %s825_s14 = scalar_select %p789_p12, 1, 0 }
  0x67   : > { %v867_v19 = vsub.f32 %v866_v57, %v2141_v2  ;;  %v915_v8 = vsub.f32 %v912_v53, %v914_v4  ;;  %v819_v41 = vand.u32 2147483647, %v2106_v50  ;;  %v821_v47 = vand.u32 2147483648, %v2106_v50  ;;  %p848_p13 = scmp.ne.f32.partialorder %s2169_s29, -1.0  ;;  %s2549_s2 = sld [smem:[#allocation20_spill]] }
  0x68   : > { %v754_v25 = vmul.f32 %v1404_v58, %v753_v15  ;;  %v921_v3 = vsub.f32 %v918_v32, %v920_v20  ;;  %v924_v48 = vstv %s2146_s18  ;;  %v712_v15 = vsel %vm2097_vm8, %v710_v40, %v2072_v31 }
  0x69   : > { %v1406_v44 = vpop.eup %1405  ;;  %v868_v7 = vmax.f32 %v867_v19, 1e-08  ;;  %v916_v51 = vmax.f32 %v915_v8, 0.0  ;;  %vm820_vm5 = vcmp.eq.f32.partialorder %v819_v41, 8.507059e+37  ;;  %s884_s28 = scalar_select %p848_p13, 1, 0 }
  0x6a   : > { %v755_v38 = vadd.f32 %v1404_v58, %v754_v25  ;;  %v811_v63 = vmul.f32 %v1406_v44, %v2106_v50  ;;  %vm816_vm1 = vweird.f32 %v1406_v44  ;;  %v922_v36 = vmax.f32 %v921_v3, 0.0  ;;  %v1436_v45 = vld [vmem:[%s2541_s9 + $0x4] ss:$8 sm:$0x3] }
  0x6b   : > { %1407 = vrcp.f32 %v868_v7  ;;  %v925_v25 = vadd.f32 %v924_v48, %v1629_v22  ;;  %vm2189_vm2 = vmor %vm815_vm0, %vm816_vm1  ;;  %v826_v22 = vstv %s825_s14  ;;  %vm874_vm7 = vweird.f32 %v868_v7 }
  0x6c   : > { %v759_v46 = vsel %vm2155_vm12, %v1404_v58, %v755_v38  ;;  %v812_v57 = vsub.f32 1.0, %v811_v63  ;;  %v776_v58 = vstv %s1992_s15  ;;  %v2193_v31 = vmul.f32 %v922_v36, %v916_v51  ;;  %s905_s15 = sadd.s32 4, %s2003_s27 }
  0x6d   : > { %v764_v17 = vsel %vm761_vm13, %v763_v12, %v759_v46  ;;  %v822_v12 = vor.u32 1.1754944e-38, %v821_v47  ;;  %vm827_vm6 = vcmp.eq.s32.totalorder %v826_v22, 1  ;;  %s2221_s25 = sld [smem:[#allocation2 + %s905_s15]]  ;;  %s1471_s15 = smov 1.0  }
  0x6e   : > { %v765_v53 = vmul.f32 %v764_v17, %v2009_v43  ;;  %v813_v4 = vmul.f32 %v1406_v44, %v812_v57  ;;  %v926_v10 = vsub.f32 %v925_v25, %v2193_v31  ;;  %v894_v25 = vstv %s2169_s29  ;;  %s290_s22 = scalar_lea.vmem %s2549_s2, %s2548_s21 }
  0x70   : > { %v769_v32 = vsel %vm2164_vm15, %v765_v53, -1.0  ;;  %v814_v40 = vadd.f32 %v1406_v44, %v813_v4  ;;  %v927_v41 = vmax.f32 %v926_v10, 1e-08 }
  0x71   : > { %vm2195_vm4 = vcmp.gt.f32.partialorder %v769_v32, %v712_v15  ;;  %v1408_v20 = vpop.eup %1407 }
  0x72   : > { %v772_v50 = vsel %vm2195_vm4, %v736_v34, %v2112_v30  ;;  %v774_v19 = vsel %vm2195_vm4, %v734_v9, %v2118_v59  ;;  %v777_v8 = vsel %vm2195_vm4, %v776_v58, %v2122_v62  ;;  %v818_v38 = vsel %vm2189_vm2, %v1406_v44, %v814_v40 }
  0x73   : > { %v823_v63 = vsel %vm820_vm5, %v822_v12, %v818_v38  ;;  %v835_v34 = vstv %s2094_s0  ;;  %v870_v30 = vmul.f32 %v1408_v20, %v868_v7  ;;  %v771_v9 = vsel %vm2195_vm4, %v769_v32, %v712_v15  ;;  %p907_p0 = scmp.ne.f32.partialorder %s2221_s25, -1.0 }
  0x74   : > { %v824_v59 = vmul.f32 %v823_v63, %v2078_v33  ;;  %v880_v62 = vand.u32 2147483648, %v868_v7  ;;  %vm875_vm9 = vweird.f32 %v1408_v20  ;;  %v878_v44 = vand.u32 2147483647, %v868_v7 }
  0x75   : > { %v871_v47 = vsub.f32 1.0, %v870_v30  ;;  %1409 = vrcp.f32 %v927_v41  ;;  %vm876_vm12 = vmor %vm874_vm7, %vm875_vm9  ;;  %v885_v15 = vstv %s884_s28  ;;  %v939_v12 = vand.u32 2147483648, %v927_v41  ;;  %s943_s5 = scalar_select %p907_p0, 1, 0 }
  0x76   : > { %v828_v46 = vsel %vm827_vm6, %v824_v59, -1.0  ;;  %v881_v17 = vor.u32 1.1754944e-38, %v880_v62  ;;  %vm879_vm13 = vcmp.eq.f32.partialorder %v878_v44, 8.507059e+37  ;;  %vm886_vm15 = vcmp.eq.s32.totalorder %v885_v15, 1 }
  0x77   : > { %vm2225_vm11 = vcmp.gt.f32.partialorder %v828_v46, %v771_v9  ;;  %v872_v3 = vmul.f32 %v1408_v20, %v871_v47  ;;  %vm933_vm1 = vweird.f32 %v927_v41  ;;  %v937_v22 = vand.u32 2147483647, %v927_v41 }
  0x78   : > { %v831_v33 = vsel %vm2225_vm11, %v795_v28, %v772_v50  ;;  %v833_v48 = vsel %vm2225_vm11, %v793_v60, %v774_v19  ;;  %v836_v7 = vsel %vm2225_vm11, %v835_v34, %v777_v8  ;;  %v830_v28 = vsel %vm2225_vm11, %v828_v46, %v771_v9 }
  0x79   : > { %v873_v57 = vadd.f32 %v1408_v20, %v872_v3  ;;  %v1001_v38 = vlaneseq  ;;  %vm938_vm6 = vcmp.eq.f32.partialorder %v937_v22, 8.507059e+37  ;;  %v944_v63 = vstv %s943_s5 }
  0x7a   : > { %vm945_vm7 = vcmp.eq.s32.totalorder %v944_v63, 1  ;;  %v953_v59 = vstv %s2221_s25 }
  0x7b   : > { %v877_v53 = vsel %vm876_vm12, %v1408_v20, %v873_v57  ;;  %v1410_v36 = vpop.eup %1409  ;;  %v940_v20 = vor.u32 1.1754944e-38, %v939_v12 }
  0x7c   : > { %v882_v58 = vsel %vm879_vm13, %v881_v17, %v877_v53  ;;  %v929_v4 = vmul.f32 %v1410_v36, %v927_v41  ;;  %vm934_vm2 = vweird.f32 %v1410_v36  ;;  %v1469_v53 = vmov 0.0   ;;  %v1314_v41 = vld [vmem:[%s2541_s9 + $0x7] ss:$8 sm:$0x3] }
  0x7d   : > { %v883_v60 = vmul.f32 %v882_v58, %v2141_v2  ;;  %vm935_vm5 = vmor %vm933_vm1, %vm934_vm2 }
  0x7e   : > { %v930_v11 = vsub.f32 1.0, %v929_v4 }
  0x7f   : > { %v887_v32 = vsel %vm886_vm15, %v883_v60, -1.0 }
  0x80   : > { %vm2244_vm0 = vcmp.gt.f32.partialorder %v887_v32, %v830_v28  ;;  %v931_v8 = vmul.f32 %v1410_v36, %v930_v11 }
  0x81   : > { %v890_v50 = vsel %vm2244_vm0, %v854_v56, %v831_v33  ;;  %v892_v2 = vsel %vm2244_vm0, %v852_v54, %v833_v48  ;;  %v895_v19 = vsel %vm2244_vm0, %v894_v25, %v836_v7  ;;  %v1002_v56 = vshrl.u32 %v1001_v38, 7 }
  0x82   : > { %v932_v10 = vadd.f32 %v1410_v36, %v931_v8  ;;  %v889_v54 = vsel %vm2244_vm0, %v887_v32, %v830_v28  ;;  %v1468_v7 = vmov -1.0  }
  0x83   : > { %v1003_v47 = vcvt.s32.f32 %v1002_v56 }
  0x84   : > { %v936_v34 = vsel %vm935_vm5, %v1410_v36, %v932_v10 }
  0x85   : > { %v941_v30 = vsel %vm938_vm6, %v940_v20, %v936_v34  ;;  %vm964_vm6 = vcmask 1040384  }
  0x86   : > { %v942_v9 = vmul.f32 %v941_v30, %v2193_v31 }
  0x88   : > { %v946_v62 = vsel %vm945_vm7, %v942_v9, -1.0  ;;  %vm414_vm7 = vcmask 261120  }
  0x89   : > { %vm2263_vm9 = vcmp.gt.f32.partialorder %v946_v62, %v889_v54 }
  0x8a   : > { %v2269_v44 = vsel %vm2263_vm9, %v946_v62, %v889_v54  ;;  %v949_v46 = vsel %vm2263_vm9, %v913_v61, %v890_v50  ;;  %v951_v3 = vsel %vm2263_vm9, %v911_v26, %v892_v2  ;;  %v954_v31 = vsel %vm2263_vm9, %v953_v59, %v895_v19  ;;  %v402_v19 = vld [vmem:[%s2455_s4] sm:$0xff]  ;;  %v403_v59 = vld [vmem:[%s2455_s4 + $0x8] sm:$0xff] }
  0x8b   : > { %vm955_vm12 = vcmp.ge.f32.partialorder %v2269_v44, 0.5  ;;  %vm956_vm13 = vcmp.lt.f32.partialorder %v2269_v44, 0.4  ;;  %v1005_v33 = vperm.slane %v954_v31, 0  ;;  %v1006_v48 = vperm.slane %v954_v31, 1  ;;  %406 = vperm.xlu2 %1394, %v402_v19  }
  0x8c   : > { %v1015_v17 = vsel %vm956_vm13, 0.0, %v1468_v7  ;;  %v2283_v57 = vsub.f32 %v951_v3, %v949_v46  ;;  %v957_v61 = vsel %vm955_vm12, 1, %v1467_v1  ;;  %v1324_v8 = vsel %vm955_vm12, 1.0, %v1469_v53 }
  0x8d   : > { %vm1009_vm15 = vcmp.eq.f32.partialorder %v1003_v47, %v1005_v33  ;;  %vm1010_vm1 = vcmp.eq.f32.partialorder %v1003_v47, %v1006_v48  ;;  %v1021_v26 = vperm.slane %v1015_v17, 0  ;;  %v1022_v15 = vperm.slane %v1015_v17, 1 }
  0x8e   : > { %v1325_v36 = vsel %vm1009_vm15, 1.0, %v1469_v53  ;;  %v1326_v58 = vsel %vm1010_vm1, 1.0, %v1469_v53  ;;  %v1085_v28 = vmul.f32 0.5, %v2283_v57  ;;  %v1016_v60 = vperm.slane %v957_v61, 0 }
  0x8f   : > { %v1017_v4 = vperm.slane %v957_v61, 1  ;;  %v319_v2 = vpop.permute.xlu0 %318  ;;  %v960_v20 = vperm.slane %v1324_v8, 0  ;;  %v961_v10 = vperm.slane %v1324_v8, 1  ;;  %v309_v63 = vpop.permute.xlu1 %308 }
  0x90   : > { %v2289_v25 = vadd.f32 %v1085_v28, %v949_v46  ;;  %vm1018_vm2 = vcmp.eq.s32.totalorder %v1016_v60, 1 }
  0x91   : > { %vm1019_vm5 = vcmp.eq.s32.totalorder %v1017_v4, 1  ;;  %v2291_v32 = vsel %vm1018_vm2, %v1325_v36, %v1021_v26  ;;  %v965_v34 = vsel %vm964_vm6, %v960_v20, 0.0  ;;  %v966_v30 = vsel %vm964_vm6, %v961_v10, 0.0 }
  0x92   : > { %v2293_v11 = vsel %vm1019_vm5, %v1326_v58, %v1022_v15  ;;  %v967_v9 = vadd.f32 %v966_v30, %v965_v34  ;;  %vm1027_vm1 = vcmp.eq.f32.partialorder %v2291_v32, 1.0 }
  0x93   : > { %411 = vperm.xlu2 %1394, %v403_v59   ;;  %vm1028_vm2 = vcmp.eq.f32.partialorder %v2293_v11, 1.0 }
  0x94   : > { %968 = vadd.xlane.f32.xlu0 %v967_v9 }
  0x97   : > { %v314_v62 = vpop.permute.xlu0 %313  ;;  %v304_v7 = vpop.permute.xlu1 %303 }
  0x9d   : > { %v380_v12 = vpop.f32.mrf.mxu1 }
  0x9e   : > { %v351_v1 = vpop.f32.mrf.mxu0  ;;  %v381_v36 = vadd.f32 %v380_v12, %v304_v7  ;;  %v401_v12 = vld [vmem:[%s2535_s11 + $0x8] sm:$0xff] }
  0x9f   : > { %v352_v53 = vadd.f32 %v351_v1, %v304_v7  ;;  %v400_v1 = vld [vmem:[%s2535_s11] sm:$0xff] }
  0xa1   : > { %v392_v19 = vmax.f32 %v352_v53, 0.0 }
  0xa5   : > { %v383_v50 = vpop.f32.mrf.mxu1 }
  0xa6   : > { %v354_v22 = vpop.f32.mrf.mxu0  ;;  %v384_v61 = vadd.f32 %v383_v50, %v309_v63  ;;  %v537_v50 = vsel %vm534_vm10, %v506_v16, 0.0 }
  0xa7   : > { %v355_v17 = vadd.f32 %v354_v22, %v309_v63  ;;  %v539_v22 = vsel %vm534_vm10, %v504_v21, 0.0  ;;  %v596_v8 = vsel %vm1913_vm14, %v565_v27, %v537_v50  ;;  %v1313_v50 = vld [vmem:[%s2541_s9 + $0x6] ss:$8 sm:$0x3] }
  0xa8   : > { %v395_v4 = vmax.f32 %v384_v61, 0.0  ;;  %v598_v20 = vsel %vm1913_vm14, %v563_v39, %v539_v22  ;;  %v655_v10 = vsel %vm2005_vm3, %v624_v52, %v596_v8  ;;  %v1435_v39 = vld [vmem:[%s2541_s9 + $0x5] ss:$8 sm:$0x3]  ;;  %v1103_v61 = vand.u32 2147483648, %v1436_v45 }
  0xa9   : > { %v394_v60 = vmax.f32 %v355_v17, 0.0  ;;  %v657_v21 = vsel %vm2005_vm3, %v622_v55, %v598_v20  ;;  %v714_v16 = vsel %vm2097_vm8, %v683_v5, %v655_v10  ;;  %1411 = vrcp.f32 %v1435_v39 }
  0xaa   : > { %v716_v27 = vsel %vm2097_vm8, %v681_v29, %v657_v21  ;;  %v773_v52 = vsel %vm2195_vm4, %v742_v49, %v714_v16  ;;  %1413 = vrcp.f32 %v1436_v45  ;;  %vm1113_vm10 = vweird.f32 %v1435_v39 }
  0xab   : > { %v775_v55 = vsel %vm2195_vm4, %v740_v18, %v716_v27  ;;  %v832_v5 = vsel %vm2225_vm11, %v801_v35, %v773_v52  ;;  %v1117_v59 = vand.u32 2147483647, %v1435_v39  ;;  %vm1097_vm8 = vweird.f32 %v1436_v45 }
  0xac   : > { %v834_v29 = vsel %vm2225_vm11, %v799_v23, %v775_v55  ;;  %v891_v49 = vsel %vm2244_vm0, %v860_v24, %v832_v5  ;;  %v1104_v8 = vor.u32 1.1754944e-38, %v1103_v61  ;;  %v1091_v27 = vsub.f32 %v2289_v25, %v1313_v50 }
  0xad   : > { %v386_v54 = vpop.f32.mrf.mxu1  ;;  %v893_v18 = vsel %vm2244_vm0, %v858_v14, %v834_v29  ;;  %v950_v35 = vsel %vm2263_vm9, %v919_v13, %v891_v49  ;;  %v1119_v14 = vand.u32 2147483648, %v1435_v39  ;;  %vm1118_vm11 = vcmp.eq.f32.partialorder %v1117_v59, 8.507059e+37 }
  0xae   : > { %v357_v56 = vpop.f32.mrf.mxu0  ;;  %v387_v31 = vadd.f32 %v386_v54, %v314_v62  ;;  %v952_v23 = vsel %vm2263_vm9, %v917_v37, %v893_v18  ;;  %v1089_v49 = vmax.f32 %v2283_v57, 1.0 }
  0xaf   : > { %v358_v3 = vadd.f32 %v357_v56, %v314_v62  ;;  %v1412_v0 = vpop.eup %1411  ;;  %v1084_v51 = vsub.f32 %v952_v23, %v950_v35 }
  0xb0   : > { %v397_v28 = vmax.f32 %v387_v31, 0.0  ;;  %v1109_v42 = vmul.f32 %v1435_v39, %v1412_v0  ;;  %v1414_v6 = vpop.eup %1413  ;;  %vm1114_vm14 = vweird.f32 %v1412_v0 }
  0xb1   : > { %v396_v58 = vmax.f32 %v358_v3, 0.0  ;;  %v1093_v63 = vmul.f32 %v1436_v45, %v1414_v6  ;;  %v1087_v24 = vmul.f32 0.5, %v1084_v51  ;;  %vm2385_vm3 = vmor %vm1113_vm10, %vm1114_vm14  ;;  %vm1098_vm4 = vweird.f32 %v1414_v6 }
  0xb2   : > { %v1110_v43 = vsub.f32 1.0, %v1109_v42  ;;  %vm2396_vm0 = vmor %vm1097_vm8, %vm1098_vm4  ;;  %vm1050_vm10 = vcmp.ne.f32.partialorder %v2293_v11, -1.0 }
  0xb3   : > { %v1094_v56 = vsub.f32 1.0, %v1093_v63 }
  0xb4   : > { %v1111_v34 = vmul.f32 %v1412_v0, %v1110_v43 }
  0xb5   : > { %v389_v46 = vpop.f32.mrf.mxu1 }
  0xb6   : > { %v360_v47 = vpop.f32.mrf.mxu0  ;;  %v390_v48 = vadd.f32 %v389_v46, %v319_v2  ;;  %v1112_v9 = vadd.f32 %v1412_v0, %v1111_v34  ;;  %v1095_v46 = vmul.f32 %v1414_v6, %v1094_v56 }
  0xb7   : > { %v361_v33 = vadd.f32 %v360_v47, %v319_v2  ;;  %v393_v2 = vmax.f32 %v381_v36, 0.0  ;;  %v1088_v47 = vadd.f32 %v1087_v24, %v950_v35 }
  0xb8   : > { %v399_v15 = vmax.f32 %v390_v48, 0.0  ;;  %v1116_v48 = vsel %vm2385_vm3, %v1412_v0, %v1112_v9 }
  0xb9   : > { %v398_v26 = vmax.f32 %v361_v33, 0.0  ;;  %v1120_v33 = vor.u32 1.1754944e-38, %v1119_v14  ;;  %v1107_v53 = vsub.f32 %v1088_v47, %v1314_v41 }
  0xba   : > { %456 = vmatpush.msra.mxu3 %v399_v15  ;;  %v1101_v15 = vand.u32 2147483647, %v1436_v45 }
  0xbb   : > { %433 = vmatpush.msra.mxu2 %v398_v26  ;;  %v1096_v26 = vadd.f32 %v1414_v6, %v1095_v46 }
  0xbc   : > { %457 = vmatpush.msra.mxu3 %v397_v28  ;;  %vm1102_vm9 = vcmp.eq.f32.partialorder %v1101_v15, 8.507059e+37 }
  0xbd   : > { %434 = vmatpush.msra.mxu2 %v396_v58  ;;  %v1100_v20 = vsel %vm2396_vm0, %v1414_v6, %v1096_v26 }
  0xbe   : > { %458 = vmatpush.msra.mxu3 %v395_v4  ;;  %v1105_v39 = vsel %vm1102_vm9, %v1104_v8, %v1100_v20 }
  0xbf   : > { %435 = vmatpush.msra.mxu2 %v394_v60  ;;  %v1090_v60 = vmax.f32 %v1084_v51, 1.0  ;;  %v1106_v45 = vmul.f32 %v1105_v39, %v1091_v27  ;;  %v1123_v25 = vmul.f32 %v1105_v39, %v1089_v49 }
  0xc0   : > { %459 = vmatpush.msra.mxu3 %v393_v2 }
  0xc1   : > { %436 = vmatpush.msra.mxu2 %v392_v19  ;;  %1306 = vmatmul.msk.f32.vlgmr.msra.gmra.mxu3 %vm414_vm7, %v400_v1  ;;  %v1121_v19 = vsel %vm1118_vm11, %v1120_v33, %v1116_v48 }
  0xc2   : > { %1304 = vmatmul.msk.f32.vlgmr.msra.gmra.mxu2 %vm414_vm7, %v400_v1  ;;  %v1122_v10 = vmul.f32 %v1121_v19, %v1107_v53  ;;  %v1126_v21 = vmul.f32 %v1121_v19, %v1090_v60  ;;  %v1041_v53 = vsub.f32 1.0, %v2291_v32 }
  0xc9   : > { %1307 = vmatmul.msk.f32.gmra.mxu3 %vm414_vm7, %v401_v12 }
  0xca   : > { %1305 = vmatmul.msk.f32.gmra.mxu2 %vm414_vm7, %v401_v12  ;;  %vm1049_vm7 = vcmp.ne.f32.partialorder %v2291_v32, -1.0 }
  0xe5   : > { %v407_v30 = vpop.permute.xlu2 %406 }
  0xed   : > { %v412_v36 = vpop.permute.xlu2 %411 }
 0x107   : > { %v969_v63 = vpop.xlane.xlu0 %968 }
 0x108   : > { %v970_v56 = vrot.slane %v969_v63, 4 }
 0x10a   : > { %v971_v47 = vadd.f32 %v970_v56, %v969_v63 }
 0x144   : > { %v461_v54 = vpop.f32.mrf.mxu3 }
 0x145   : > { %v438_v40 = vpop.f32.mrf.mxu2  ;;  %v2383_v13 = vadd.f32 %v461_v54, %v407_v30 }
 0x146   : > { %v2381_v62 = vadd.f32 %v438_v40, %v407_v30 }
 0x147   : > { %v978_v31 = vand.u32 2147483647, %v2383_v13  ;;  %v992_v54 = vmin.f32 %v2383_v13, 0.0 }
 0x148   : > { %v977_v3 = vand.u32 2147483647, %v2381_v62  ;;  %v991_v40 = vmin.f32 %v2381_v62, 0.0 }
 0x149   : > { %v980_v17 = vsub.f32 0.0, %v978_v31 }
 0x14a   : > { %v979_v7 = vsub.f32 0.0, %v977_v3 }
 0x14b   : > { %v983_v28 = vmul.f32 1.442695, %v980_v17 }
 0x14c   : > { %v981_v58 = vmul.f32 1.442695, %v979_v7  ;;  %v464_v1 = vpop.f32.mrf.mxu3  ;;  %v972_v7 = vrot.slane %v971_v47, 2 }
 0x14d   : > { %v441_v2 = vpop.f32.mrf.mxu2  ;;  %v465_v22 = vadd.f32 %v464_v1, %v412_v36 }
 0x14e   : > { %1415 = vpow2.f32 %v981_v58  ;;  %v442_v12 = vadd.f32 %v441_v2, %v412_v36  ;;  %v973_v4 = vadd.f32 %v972_v7, %v971_v47  ;;  %v1042_v2 = vsub.f32 1.0, %v2293_v11 }
 0x14f   : > { %1417 = vpow2.f32 %v983_v28  ;;  %v1131_v16 = vrot.slane %v465_v22, 7  ;;  %1142 = vst [vmem:[#allocation1 + $0x9] sm:$0xff] %v465_v22 }
 0x150   : > { %1141 = vst [vmem:[#allocation1] sm:$0xff] %v442_v12  ;;  %1419 = vlog2.f32 %v1126_v21  ;;  %v974_v50 = vrot.slane %v973_v4, 1 }
 0x151   : > { %v1132_v52 = vsel %vm964_vm6, %v442_v12, %v1131_v16  ;;  %v1470_v16 = vmov 0.75  }
 0x152   : > { %v1134_v55 = vsub.f32 %v1122_v10, %v1132_v52  ;;  %v1030_v49 = vsel %vm1028_vm2, 0.25, %v1470_v16 }
 0x154   : > { %v1416_v0 = vpop.eup %1415  ;;  %v1135_v42 = vand.u32 2147483647, %v1134_v55 }
 0x155   : > { %v1418_v5 = vpop.eup %1417  ;;  %v985_v29 = vadd.f32 1.0, %v1416_v0 }
 0x156   : > { %v986_v18 = vadd.f32 1.0, %v1418_v5  ;;  %v1420_v23 = vpop.eup %1419  ;;  %v1137_v43 = vmul.f32 4.5, %v1135_v42  ;;  %v1327_v3 = vadd.f32 -0.055555556, %v1135_v42  ;;  %vm1136_vm15 = vcmp.le.f32.partialorder %v1135_v42, 0.11111111 }
 0x157   : > { %1421 = vlog2.f32 %v985_v29  ;;  %v1144_v6 = vld [vmem:[#allocation1 + $0x1] ss:$9 sm:$0xff]  ;;  %v1128_v30 = vmul.f32 0.6931472, %v1420_v23 }
 0x158   : > { %1423 = vlog2.f32 %v986_v18  ;;  %v1146_v35 = vsub.f32 %v1106_v45, %v1144_v6  ;;  %1154 = vst [vmem:[#allocation1] sm:$0xff] %v442_v12  ;;  %v1138_v9 = vmul.f32 %v1137_v43, %v1135_v42 }
 0x159   : > { %1155 = vst [vmem:[#allocation1 + $0x9] sm:$0xff] %v465_v22  ;;  %1425 = vlog2.f32 %v1123_v25 }
 0x15a   : > { %v1147_v51 = vand.u32 2147483647, %v1146_v35  ;;  %v1140_v26 = vsel %vm1136_vm15, %v1138_v9, %v1327_v3 }
 0x15c   : > { %v1149_v24 = vmul.f32 4.5, %v1147_v51  ;;  %v1328_v41 = vadd.f32 -0.055555556, %v1147_v51  ;;  %vm1148_vm13 = vcmp.le.f32.partialorder %v1147_v51, 0.11111111 }
 0x15d   : > { %v1422_v34 = vpop.eup %1421 }
 0x15e   : > { %v1424_v14 = vpop.eup %1423  ;;  %v988_v57 = vmul.f32 0.6931472, %v1422_v34  ;;  %v1150_v37 = vmul.f32 %v1149_v24, %v1147_v51 }
 0x15f   : > { %v990_v59 = vmul.f32 0.6931472, %v1424_v14  ;;  %v1426_v15 = vpop.eup %1425 }
 0x160   : > { %v993_v46 = vsub.f32 %v991_v40, %v988_v57  ;;  %v1157_v33 = vld [vmem:[#allocation1 + $0x2] ss:$9 sm:$0xff]  ;;  %v1152_v48 = vsel %vm1148_vm13, %v1150_v37, %v1328_v41 }
 0x161   : > { %v994_v31 = vsub.f32 %v992_v54, %v990_v59  ;;  %v1159_v61 = vsub.f32 %v1128_v30, %v1157_v33  ;;  %1167 = vst [vmem:[#allocation1] sm:$0xff] %v442_v12  ;;  %v1153_v58 = vadd.f32 %v1152_v48, %v1140_v26  ;;  %v1125_v12 = vmul.f32 0.6931472, %v1426_v15 }
 0x162   : > { %v997_v17 = vmul.f32 1.442695, %v993_v46  ;;  %1168 = vst [vmem:[#allocation1 + $0x9] sm:$0xff] %v465_v22  ;;  %v995_v28 = vsub.f32 %v993_v46, %v2381_v62  ;;  %v975_v62 = vadd.f32 %v974_v50, %v973_v4  ;;  %v1039_v27 = vmul.f32 %v2291_v32, %v993_v46 }
 0x163   : > { %v999_v36 = vmul.f32 1.442695, %v994_v31  ;;  %v1160_v60 = vand.u32 2147483647, %v1159_v61  ;;  %v996_v19 = vsub.f32 %v994_v31, %v2383_v13  ;;  %v1029_v13 = vsel %vm1027_vm1, 0.25, %v1470_v16 }
 0x164   : > { %1427 = vpow2.f32 %v997_v17  ;;  %v1043_v8 = vmul.f32 %v1041_v53, %v995_v28  ;;  %v1040_v5 = vmul.f32 %v2293_v11, %v994_v31  ;;  %1356 = vpush %v975_v62 }
 0x165   : > { %1429 = vpow2.f32 %v999_v36  ;;  %v1162_v1 = vmul.f32 4.5, %v1160_v60  ;;  %v1329_v10 = vadd.f32 -0.055555556, %v1160_v60  ;;  %v1044_v22 = vmul.f32 %v1042_v2, %v996_v19 }
 0x166   : > { %vm1161_vm5 = vcmp.le.f32.partialorder %v1160_v60, 0.11111111  ;;  %v1045_v42 = vadd.f32 %v1043_v8, %v1039_v27 }
 0x167   : > { %v1163_v20 = vmul.f32 %v1162_v1, %v1160_v60  ;;  %v1046_v35 = vadd.f32 %v1044_v22, %v1040_v5 }
 0x168   : > { %v1047_v30 = vsub.f32 0.0, %v1045_v42 }
 0x169   : > { %v1165_v39 = vsel %vm1161_vm5, %v1163_v20, %v1329_v10  ;;  %v1170_v52 = vld [vmem:[#allocation1 + $0x3] ss:$9 sm:$0xff]  ;;  %v1048_v56 = vsub.f32 0.0, %v1046_v35 }
 0x16a   : > { %v1428_v21 = vpop.eup %1427  ;;  %v1166_v29 = vadd.f32 %v1165_v39, %v1153_v58  ;;  %v1172_v45 = vsub.f32 %v1125_v12, %v1170_v52 }
 0x16b   : > { %v1430_v55 = vpop.eup %1429  ;;  %v1031_v0 = vsub.f32 1.0, %v1428_v21 }
 0x16c   : > { %v1032_v18 = vsub.f32 1.0, %v1430_v55  ;;  %v1173_v25 = vand.u32 2147483647, %v1172_v45 }
 0x16d   : > { %v1033_v6 = vsel %vm1027_vm1, %v1031_v0, %v1428_v21 }
 0x16e   : > { %v1034_v23 = vsel %vm1028_vm2, %v1032_v18, %v1430_v55  ;;  %v1035_v43 = vmul.f32 %v1033_v6, %v1029_v13  ;;  %v1175_v63 = vmul.f32 4.5, %v1173_v25  ;;  %v1330_v57 = vadd.f32 -0.055555556, %v1173_v25 }
 0x16f   : > { %v1036_v51 = vmul.f32 %v1034_v23, %v1030_v49  ;;  %vm1174_vm14 = vcmp.le.f32.partialorder %v1173_v25, 0.11111111 }
 0x170   : > { %v1037_v34 = vmul.f32 %v1035_v43, %v1033_v6  ;;  %v1176_v14 = vmul.f32 %v1175_v63, %v1173_v25  ;;  %v1220_v6 = vand.u32 127, %v1001_v38 }
 0x171   : > { %v1038_v24 = vmul.f32 %v1036_v51, %v1034_v23 }
 0x172   : > { %v1051_v40 = vmul.f32 %v1047_v30, %v1037_v34  ;;  %v1178_v9 = vsel %vm1174_vm14, %v1176_v14, %v1330_v57  ;;  %vm1222_vm13 = vcmp.eq.s32.totalorder %v1220_v6, 1  ;;  %vm1221_vm15 = vcmp.eq.s32.totalorder %v1220_v6, 0 }
 0x173   : > { %v1052_v54 = vmul.f32 %v1048_v56, %v1038_v24  ;;  %v1179_v37 = vadd.f32 %v1178_v9, %v1166_v29 }
 0x174   : > { %v1053_v59 = vsel %vm1049_vm7, %v1051_v40, 0.0 }
 0x175   : > { %v1054_v41 = vsel %vm1050_vm10, %v1052_v54, 0.0  ;;  %v1180_v46 = vsel %vm955_vm12, %v1179_v37, 0.0 }
 0x176   : > { %v1055_v47 = vadd.f32 %v1054_v41, %v1053_v59  ;;  %v1182_v3 = vperm.slane %v1180_v46, 0  ;;  %v1183_v31 = vperm.slane %v1180_v46, 1 }
 0x178   : > { %1056 = vadd.xlane.f32.xlu1 %v1055_v47  ;;  %v1186_v32 = vsel %vm964_vm6, %v1182_v3, 0.0  ;;  %v1187_v33 = vsel %vm964_vm6, %v1183_v31, 0.0 }
 0x179   : > { %v1188_v48 = vadd.f32 %v1187_v33, %v1186_v32 }
 0x17b   : > { %1189 = vadd.xlane.f32.xlu2 %v1188_v48 }
 0x195   : > { %s2432_s17 = spop %1356 }
 0x196   : > { %s1065_s25 = smax.f32 %s1471_s15, %s2432_s17  ;;  %s1199_s28 = smul.f32 4.0, %s2432_s17 }
 0x197   : > { %v1066_v11 = vstv %s1065_s25  ;;  %p1198_p1 = scmp.gt.f32.partialorder %s2432_s17, 0.0 }
 0x198   : > { %s1200_s5 = smax.f32 %s1471_s15, %s1199_s28  ;;  %1431 = vrcp.f32 %v1066_v11  ;;  %vm1072_vm12 = vweird.f32 %v1066_v11  ;;  %v1078_v1 = vand.u32 2147483648, %v1066_v11  ;;  %v1076_v50 = vand.u32 2147483647, %v1066_v11 }
 0x199   : > { %v1201_v44 = vstv %s1200_s5 }
 0x19a   : > { %1433 = vrcp.f32 %v1201_v44  ;;  %vm1207_vm8 = vweird.f32 %v1201_v44  ;;  %v1079_v16 = vor.u32 1.1754944e-38, %v1078_v1  ;;  %v1213_v13 = vand.u32 2147483648, %v1201_v44 }
 0x19b   : > { %vm1077_vm11 = vcmp.eq.f32.partialorder %v1076_v50, 8.507059e+37  ;;  %v1211_v52 = vand.u32 2147483647, %v1201_v44 }
 0x19c   : > { %v1214_v45 = vor.u32 1.1754944e-38, %v1213_v13 }
 0x19d   : > { %vm1212_vm9 = vcmp.eq.f32.partialorder %v1211_v52, 8.507059e+37 }
 0x19e   : > { %v1432_v7 = vpop.eup %1431 }
 0x19f   : > { %v1068_v17 = vmul.f32 %v1432_v7, %v1066_v11  ;;  %vm1073_vm6 = vweird.f32 %v1432_v7 }
 0x1a0   : > { %v1434_v61 = vpop.eup %1433  ;;  %vm2436_vm3 = vmor %vm1072_vm12, %vm1073_vm6 }
 0x1a1   : > { %v1069_v26 = vsub.f32 1.0, %v1068_v17  ;;  %v1203_v15 = vmul.f32 %v1434_v61, %v1201_v44  ;;  %vm1208_vm4 = vweird.f32 %v1434_v61 }
 0x1a2   : > { %vm1209_vm0 = vmor %vm1207_vm8, %vm1208_vm4 }
 0x1a3   : > { %v1070_v58 = vmul.f32 %v1432_v7, %v1069_v26  ;;  %v1204_v28 = vsub.f32 1.0, %v1203_v15 }
 0x1a5   : > { %v1071_v12 = vadd.f32 %v1432_v7, %v1070_v58  ;;  %v1205_v8 = vmul.f32 %v1434_v61, %v1204_v28 }
 0x1a7   : > { %v1075_v27 = vsel %vm2436_vm3, %v1432_v7, %v1071_v12  ;;  %v1206_v39 = vadd.f32 %v1434_v61, %v1205_v8 }
 0x1a8   : > { %v1080_v5 = vsel %vm1077_vm11, %v1079_v16, %v1075_v27 }
 0x1a9   : > { %v1210_v49 = vsel %vm1209_vm0, %v1434_v61, %v1206_v39 }
 0x1aa   : > { %v1215_v42 = vsel %vm1212_vm9, %v1214_v45, %v1210_v49 }
 0x1eb   : > { %v1057_v53 = vpop.xlane.xlu1 %1056 }
 0x1ec   : > { %v1058_v36 = vrot.slane %v1057_v53, 4 }
 0x1ee   : > { %v1059_v60 = vadd.f32 %v1058_v36, %v1057_v53  ;;  %v1190_v4 = vpop.xlane.xlu2 %1189 }
 0x1ef   : > { %v1191_v2 = vrot.slane %v1190_v4, 4 }
 0x1f0   : > { %v1060_v19 = vrot.slane %v1059_v60, 2 }
 0x1f1   : > { %v1192_v10 = vadd.f32 %v1191_v2, %v1190_v4 }
 0x1f2   : > { %v1061_v20 = vadd.f32 %v1060_v19, %v1059_v60 }
 0x1f3   : > { %v1193_v62 = vrot.slane %v1192_v10, 2 }
 0x1f4   : > { %v1062_v21 = vrot.slane %v1061_v20, 1 }
 0x1f5   : > { %v1194_v55 = vadd.f32 %v1193_v62, %v1192_v10 }
 0x1f6   : > { %v1063_v0 = vadd.f32 %v1062_v21, %v1061_v20 }
 0x1f7   : > { %v1195_v29 = vrot.slane %v1194_v55, 1 }
 0x1f8   : > { %1358 = vpush %v1063_v0 }
 0x1f9   : > { %1360 = vpush %v1080_v5  ;;  %v1196_v18 = vadd.f32 %v1195_v29, %v1194_v55 }
 0x1fb   : > { %1362 = vpush %v1196_v18 }
 0x1fc   : > { %1364 = vpush %v1215_v42 }
 0x229   : > { %s1359_s6 = spop %1358 }
 0x22a   : > { %s1361_s8 = spop %1360 }
 0x22b   : > { %s1082_s7 = smul.f32 %s1361_s8, %s1359_s6 }
 0x22c   : > { %s1363_s27 = spop %1362 }
 0x22d   : > { %s1365_s1 = spop %1364  ;;  %v1225_v25 = vstv %s1082_s7 }
 0x22e   : > { %s1217_s13 = smul.f32 %s1365_s1, %s1363_s27 }
 0x230   : > { %s2554_s13 = smov (!%p1198_p1, %s1217_s13), 0.0 }
 0x231   : > { %v1223_v35 = vstv %s2554_s13 }
 0x232   : > { %v1224_v23 = vsel %vm1222_vm13, %v1223_v35, 0.0 }
 0x233   : > { %v1226_v43 = vsel %vm1221_vm15, %v1225_v25, %v1224_v23 }
 0x234   : > { %1227 = vst [vmem:[%s290_s22] sm:$0x1] %v1226_v43 }
 0x235 PF: > { %s2550_s19 = sld [smem:[#allocation5_spill]] }
 0x23b   : > { %s18_s24 = sadd.s32 1, %s2550_s19  }
 0x23c   : > { %p15_p2 = scmp.ge.s32.totalorder %s18_s24, 4  }
 0x23e   :  { %17 = sbr.rel (!%p15_p2) target bundleno = 9 (0x9), region = 93 }
 0x243   :  { %1245 = vsyncpa [#allocation3], 1 }
 0x244   :  { %1247 = vsyncpa [#allocation3 + $0x1], 1 }

</bundles_post_ra>
